<compile_context>
chip_gen: v7x
topology: tpu7x:2x2x1
jax: 0.10.0
libtpu: 0.0.40
codegen_flags: <defaults>
</compile_context>

<pallas_src>
import functools

import jax
import jax.numpy as jnp
from jax.experimental import pallas as pl
from jax.experimental.pallas import tpu as pltpu


# ----------------------------------------------------------------------------
# Chip-dependent tiling knobs (safe fallbacks off-TPU / in interpret mode)
# ----------------------------------------------------------------------------

# Set to False if jnp.concatenate along the lane (minor) dim does not lower on a given
# Mosaic version; Cin == 64 layers then fall back to 9 K=Cin matmuls.
_USE_KWIDE_CONCAT = True


def _device_kind():
    try:
        return jax.devices()[0].device_kind.lower()
    except Exception:
        return ""


def _cout_tile(cout):
    """Lane-dense Cout tile: 256 on 256-wide-MXU chips (v6e/v7x), else 128."""
    if cout % 128 != 0:
        return cout
    narrow_mxu = any(v in _device_kind() for v in ("v2", "v3", "v4", "v5"))
    if cout % 256 == 0 and not narrow_mxu:
        return 256
    return 128


def _vmem_limit_bytes():
    # 48 MiB stays under v7x's 64 MiB physical VMEM while lifting v5e's 16 MiB default
    # scoped limit; leave the default elsewhere / in interpret mode.
    if any(v in _device_kind() for v in ("v5", "v6", "v7")):
        return 48 * 1024 * 1024
    return None


def _pick_th(h):
    """Rows per grid step: 16 at real resolutions, 8 at mid sizes, whole image when tiny."""
    if h % 16 == 0 and h > 16:
        return 16
    if h % 8 == 0 and h > 8:
        return 8
    return h


def _compiler_params(n_axes):
    kw = dict(dimension_semantics=("parallel",) * n_axes)
    vl = _vmem_limit_bytes()
    if vl is not None:
        kw["vmem_limit_bytes"] = vl
    return pltpu.CompilerParams(**kw)


# ----------------------------------------------------------------------------
# Pallas kernels
# ----------------------------------------------------------------------------

def _conv3x3_kernel(x_ref, top_ref, bot_ref, w_ref, b_ref, o_ref, *,
                    TH, W, Cin, narrow, fuse_relu, fuse_pool):
    """3x3 / stride-1 / pad-1 conv on one (image, H-tile, Cout-tile), fused epilogue.

    x_ref   : (1, TH, W+2, Cin)  bf16 rows of the W-padded activation
    top_ref : (1, 1,  W+2, Cin)  row above the tile (clamped; zeroed when h == 0)
    bot_ref : (1, 1,  W+2, Cin)  row below the tile (clamped; zeroed when h == last)
    w_ref   : (3, 3*Cin, TC) when narrow else (3, 3, Cin, TC)   bf16
    b_ref   : (1, TC)            f32
    o_ref   : (1, THo, Wo, TC)   THo/Wo halved when the 2x2 maxpool is fused
    """
    h = pl.program_id(1)
    n_h = pl.num_programs(1)
    tc = o_ref.shape[-1]
    cdt = x_ref.dtype

    # H halo: rows fetched via clamped index_maps, zeroed at the image borders.
    top = top_ref[0] * jnp.where(h > 0, 1.0, 0.0).astype(cdt)
    bot = bot_ref[0] * jnp.where(h < n_h - 1, 1.0, 0.0).astype(cdt)
    xh = jnp.concatenate([top, x_ref[0], bot], axis=0)            # (TH+2, W+2, Cin)

    m = TH * W
    acc = jnp.zeros((m, tc), jnp.float32)
    if narrow:
        # Cin == 64: collapse (kw, Cin) so the MXU contraction is K = 3*Cin = 192.
        taps = jnp.concatenate(
            [xh[:, 0:W, :], xh[:, 1:W + 1, :], xh[:, 2:W + 2, :]], axis=-1)   # (TH+2, W, 3*Cin)
        for kh in range(3):
            acc = acc + jnp.dot(taps[kh:kh + TH].reshape(m, 3 * Cin), w_ref[kh],
                                preferred_element_type=jnp.float32)
    else:
        # 9 taps of K = Cin.  For Cin >= 128 the K dim already fills the MXU, so this
        # avoids the 3x activation-sized concat copy; Cin == 3 (conv1-1) is tiny anyway.
        for kh in range(3):
            for kw in range(3):
                patch = xh[kh:kh + TH, kw:kw + W, :].reshape(m, Cin)
                acc = acc + jnp.dot(patch, w_ref[kh, kw],
                                    preferred_element_type=jnp.float32)

    # ---- f32 epilogue: bias, fused ReLU, optional fused 2x2 maxpool ----
    acc = acc + b_ref[...]
    if fuse_relu:
        acc = jnp.maximum(acc, 0.0)
    y = acc.reshape(TH, W, tc)
    if fuse_pool:
        y = jnp.max(y.reshape(TH // 2, 2, W, tc), axis=1)          # height pairs
        y = jnp.max(y.reshape(TH // 2, W // 2, 2, tc), axis=2)     # width pairs
    o_ref[0] = y.astype(o_ref.dtype)


def _maxpool2x2_kernel(x_ref, o_ref):
    """x_ref: (1, TH, W, C) -> o_ref: (1, TH//2, W//2, C), max over 2x2 windows."""
    x = x_ref[0]
    th, w, c = x.shape
    x = jnp.max(x.reshape(th // 2, 2, w, c), axis=1)
    x = jnp.max(x.reshape(th // 2, w // 2, 2, c), axis=2)
    o_ref[0] = x.astype(o_ref.dtype)


# ----------------------------------------------------------------------------
# Wrappers (BlockSpecs / grids)
# ----------------------------------------------------------------------------

def conv3x3_pallas(x_nhwc, w_hwio, b, *, fuse_relu=True, fuse_pool=False,
                   act_dtype=jnp.bfloat16):
    N, H, W, Cin = x_nhwc.shape
    Cout = w_hwio.shape[-1]
    if fuse_pool:
        assert H % 2 == 0 and W % 2 == 0
    Ho, Wo = (H // 2, W // 2) if fuse_pool else (H, W)

    TH = _pick_th(H)
    n_h = H // TH
    THo = TH // 2 if fuse_pool else TH
    TC = _cout_tile(Cout)
    n_ct = Cout // TC

    # W halo only (2 zero columns, added once in XLA); the H halo comes from the
    # clamped single-row BlockSpecs below, so the kernel never touches HBM itself.
    x_p = jnp.pad(x_nhwc.astype(act_dtype), ((0, 0), (0, 0), (1, 1), (0, 0)))

    # Pre-reshape weights here so the kernel never reshapes a weight tile per grid step.
    narrow = _USE_KWIDE_CONCAT and (8 <= Cin < 128)     # Cin == 64 in VGG
    if narrow:
        wk = w_hwio.reshape(3, 3 * Cin, Cout).astype(act_dtype)     # (kh, (kw, Cin), Cout)
        w_spec = pl.BlockSpec((3, 3 * Cin, TC), lambda n, h, j: (0, 0, j))
    else:
        wk = w_hwio.astype(act_dtype)                                # HWIO
        w_spec = pl.BlockSpec((3, 3, Cin, TC), lambda n, h, j: (0, 0, 0, j))
    bk = b.reshape(1, Cout).astype(jnp.float32)

    kernel = functools.partial(_conv3x3_kernel, TH=TH, W=W, Cin=Cin, narrow=narrow,
                               fuse_relu=fuse_relu, fuse_pool=fuse_pool)

    isz = jnp.dtype(act_dtype).itemsize
    flops = 2 * 9 * H * W * Cin * Cout * N
    bytes_accessed = (N * H * (W + 2) * Cin * isz          # activations: fetched once per (n, h)
                      + N * n_h * 9 * Cin * Cout * isz     # weights: re-fetched per (n, h), j inner
                      + Cout * 4
                      + N * Ho * Wo * Cout * isz)

    # Grid: (image, H tile, Cout tile).  Cout-tile innermost keeps the activation tile
    # resident in VMEM across all Cout tiles; weights are the (cheaper) re-fetch.
    in_specs = [
        pl.BlockSpec((1, TH, W + 2, Cin), lambda n, h, j: (n, h, 0, 0)),
        pl.BlockSpec((1, 1, W + 2, Cin),
                     lambda n, h, j: (n, jnp.maximum(h * TH - 1, 0), 0, 0)),
        pl.BlockSpec((1, 1, W + 2, Cin),
                     lambda n, h, j: (n, jnp.minimum(h * TH + TH, H - 1), 0, 0)),
        w_spec,
        pl.BlockSpec((1, TC), lambda n, h, j: (0, j)),
    ]
    out_spec = pl.BlockSpec((1, THo, Wo, TC), lambda n, h, j: (n, h, 0, j))

    return pl.pallas_call(
        kernel,
        out_shape=jax.ShapeDtypeStruct((N, Ho, Wo, Cout), act_dtype),
        grid=(N, n_h, n_ct),
        in_specs=in_specs,
        out_specs=out_spec,
        compiler_params=_compiler_params(3),
        cost_estimate=pl.CostEstimate(flops=flops, transcendentals=0,
                                      bytes_accessed=bytes_accessed),
    )(x_p, x_p, x_p, wk, bk)


def maxpool2x2_pallas(x_nhwc):
    N, H, W, C = x_nhwc.shape
    assert H % 2 == 0 and W % 2 == 0
    TH = _pick_th(H)
    if TH % 2:                                     # keep 2x2 windows inside one tile
        TH = H
    n_h = H // TH
    return pl.pallas_call(
        _maxpool2x2_kernel,
        out_shape=jax.ShapeDtypeStruct((N, H // 2, W // 2, C), x_nhwc.dtype),
        grid=(N, n_h),
        in_specs=[pl.BlockSpec((1, TH, W, C), lambda n, h: (n, h, 0, 0))],
        out_specs=pl.BlockSpec((1, TH // 2, W // 2, C), lambda n, h: (n, h, 0, 0)),
        compiler_params=_compiler_params(2),
    )(x_nhwc)


# ----------------------------------------------------------------------------
# VGG19 construction (mirrors the PyTorch __init__)
# ----------------------------------------------------------------------------

VGG19_CFG = ['conv_1-1', 'relu_1-1', 'conv_1-2', 'relu_1-2', 'pool_1',
             'conv_2-1', 'relu_2-1', 'conv_2-2', 'relu_2-2', 'pool_2',
             'conv_3-1', 'relu_3-1', 'conv_3-2', 'relu_3-2', 'conv_3-3',
             'relu_3-3', 'conv_3-4', 'relu_3-4', 'pool_3',
             'conv_4-1', 'relu_4-1', 'conv_4-2', 'relu_4-2', 'conv_4-3',
             'relu_4-3', 'conv_4-4', 'relu_4-4', 'pool_4',
             'conv_5-1', 'relu_5-1', 'conv_5-2', 'relu_5-2', 'conv_5-3',
             'relu_5-3', 'conv_5-4', 'relu_5-4', 'pool_5']
LAYER_SETTING = {'1': 64, '2': 128, '3': 256, '4': 512, '5': 512}


def build_vgg19(final_layer, prev_layer, key):
    """Deterministic synthetic parameters (no pretrained checkpoint).

    Returns (layers, prev_relu_idx); layers is a list of
    ('conv', (w_hwio, b)) / ('relu', None) / ('pool', None).
    """
    # TODO(synk): `pretrain=True` path (torchvision vgg19 checkpoint) not reproducible in-script.
    layers = []
    prev_relu_idx = []
    in_channel = 3
    for idx, layer_name in enumerate(VGG19_CFG):
        type_name, layer = layer_name.split('_')
        if type_name == 'pool':
            layers.append(('pool', None))
        elif type_name == 'conv':
            l1, _ = layer.split('-')
            out_channel = LAYER_SETTING[l1]
            key, kw_, kb_ = jax.random.split(key, 3)
            fan_in = in_channel * 9
            w = jax.random.normal(kw_, (3, 3, in_channel, out_channel),
                                  jnp.float32) * (1.0 / jnp.sqrt(fan_in))
            b = jax.random.normal(kb_, (out_channel,), jnp.float32) * 0.01
            layers.append(('conv', (w, b)))
            in_channel = out_channel
        elif type_name == 'relu':
            layers.append(('relu', None))
            if layer_name in prev_layer:
                prev_relu_idx.append(idx)
        if layer_name == final_layer:
            break
    return layers, prev_relu_idx


def vgg_forward_pallas(x_nchw, layers, prev_relu_idx, act_dtype=jnp.bfloat16):
    """Matches VGG19.forward: returns (res, x), both NCHW like PyTorch."""
    x = jnp.transpose(x_nchw, (0, 2, 3, 1)).astype(act_dtype)   # NCHW -> NHWC
    res = []
    n = len(layers)
    i = 0
    while i < n:
        t, p = layers[i]
        if t == 'conv':
            fuse_relu = (i + 1 < n) and layers[i + 1][0] == 'relu'
            collect_relu = fuse_relu and ((i + 1) in prev_relu_idx)
            # Only fuse the pool when the intermediate relu is NOT collected.
            fuse_pool = (fuse_relu and not collect_relu
                         and (i + 2 < n) and layers[i + 2][0] == 'pool')
            x = conv3x3_pallas(x, p[0], p[1], fuse_relu=fuse_relu,
                               fuse_pool=fuse_pool, act_dtype=act_dtype)
            if collect_relu:
                res.append(x)
            i += 1 + int(fuse_relu) + int(fuse_pool)
        elif t == 'relu':
            # Unreachable in VGG19 (every relu follows a conv and gets fused); kept for safety.
            x = jnp.maximum(x, 0).astype(x.dtype)
            if i in prev_relu_idx:
                res.append(x)
            i += 1
        else:  # pool
            x = maxpool2x2_pallas(x)
            i += 1
    # Keep NHWC in the hot path; convert to PyTorch NCHW once at the boundary.
    res = [jnp.transpose(r, (0, 3, 1, 2)) for r in res]
    return res, jnp.transpose(x, (0, 3, 1, 2))


# ----------------------------------------------------------------------------
# Pure-JAX reference (same bf16-operand / f32-accumulate numerics)
# ----------------------------------------------------------------------------

def vgg_forward_ref(x_nchw, layers, prev_relu_idx, act_dtype=jnp.bfloat16):
    x = x_nchw.astype(act_dtype)
    res = []
    for idx, (t, p) in enumerate(layers):
        if t == 'conv':
            w, b = p
            w_oihw = jnp.transpose(w, (3, 2, 0, 1)).astype(act_dtype)
            y = jax.lax.conv_general_dilated(
                x, w_oihw, (1, 1), ((1, 1), (1, 1)),
                dimension_numbers=('NCHW', 'OIHW', 'NCHW'),
                preferred_element_type=jnp.float32)
            x = (y + b[None, :, None, None]).astype(act_dtype)
        elif t == 'relu':
            x = jnp.maximum(x, 0).astype(act_dtype)
        elif t == 'pool':
            x = jax.lax.reduce_window(x, jnp.array(-jnp.inf, act_dtype),
                                      jax.lax.max, (1, 1, 2, 2), (1, 1, 2, 2),
                                      'VALID')
        if idx in prev_relu_idx:
            res.append(x)
    return res, x


# ----------------------------------------------------------------------------
# Main
# ----------------------------------------------------------------------------

if __name__ == "__main__":
    key = jax.random.PRNGKey(0)
    key, kx, kp = jax.random.split(key, 3)

    # VGG19 prefix: final_layer='pool_3', intermediates at relu_1-2 / relu_3-2.
    # (Exercises conv+relu, conv+relu+pool fusion, standalone pool, H-tiling with halo
    #  (16x16 maps -> 2 H-tiles), the Cin=3 / Cin=64 / Cin>=128 matmul paths, and collection.)
    final_layer = 'pool_3'
    prev_layer = ('relu_1-2', 'relu_3-2')
    layers, prev_relu_idx = build_vgg19(final_layer, prev_layer, kp)

    # PyTorch-convention NCHW input (VGG requires 3 input channels).
    x = jax.random.normal(kx, (2, 3, 16, 16), jnp.float32)

    res, out = vgg_forward_pallas(x, layers, prev_relu_idx)
    out = jax.block_until_ready(out)
    res = [jax.block_until_ready(r) for r in res]

    # Correctness check against a pure-JAX reference with matching numerics.
    res_ref, out_ref = vgg_forward_ref(x, layers, prev_relu_idx)
    assert out.shape == out_ref.shape, (out.shape, out_ref.shape)
    assert jnp.allclose(out.astype(jnp.float32), out_ref.astype(jnp.float32),
                        rtol=5e-2, atol=5e-2)
    assert len(res) == len(res_ref)
    for a, b in zip(res, res_ref):
        assert a.shape == b.shape, (a.shape, b.shape)
        assert jnp.allclose(a.astype(jnp.float32), b.astype(jnp.float32),
                            rtol=5e-2, atol=5e-2)

    print("KERNEL_OK")
</pallas_src>

<mosaic_0001>
module attributes {stable_mosaic.version = 11 : i64} {
  func.func @_conv3x3_kernel(%arg0: i32, %arg1: i32, %arg2: i32, %arg3: memref<1x8x18x3xbf16, #tpu.memory_space<vmem>>, %arg4: memref<1x1x18x3xbf16, #tpu.memory_space<vmem>>, %arg5: memref<1x1x18x3xbf16, #tpu.memory_space<vmem>>, %arg6: memref<3x3x3x64xbf16, #tpu.memory_space<vmem>>, %arg7: memref<1x64xf32, #tpu.memory_space<vmem>>, %arg8: memref<1x8x16x64xbf16, #tpu.memory_space<vmem>>) attributes {dimension_semantics = [#tpu.dimension_semantics<parallel>, #tpu.dimension_semantics<parallel>, #tpu.dimension_semantics<parallel>], iteration_bounds = array<i64: 2, 2, 1>, scalar_prefetch = 0 : i64, scratch_operands = 0 : i64, tpu.core_type = #tpu.core_type<tc>, window_params = [{transform_indices = @transform_0, window_bounds = array<i64: 1, 8, 18, 3>}, {transform_indices = @transform_1, window_bounds = array<i64: 1, 1, 18, 3>}, {transform_indices = @transform_2, window_bounds = array<i64: 1, 1, 18, 3>}, {transform_indices = @transform_3, window_bounds = array<i64: 3, 3, 3, 64>}, {transform_indices = @transform_4, window_bounds = array<i64: 1, 64>}, {transform_indices = @transform_5, window_bounds = array<i64: 1, 8, 16, 64>}]} {
    %c0 = arith.constant 0 : index
    %c0_0 = arith.constant 0 : index
    %c0_1 = arith.constant 0 : index
    %c0_2 = arith.constant 0 : index
    %0 = vector.load %arg4[%c0, %c0_0, %c0_1, %c0_2] : memref<1x1x18x3xbf16, #tpu.memory_space<vmem>>, vector<1x1x18x3xbf16>
    %1 = vector.shape_cast %0 : vector<1x1x18x3xbf16> to vector<1x18x3xbf16>
    %c0_i32 = arith.constant 0 : i32
    %2 = arith.cmpi sgt, %arg1, %c0_i32 : i32
    %cst = arith.constant 1.000000e+00 : f32
    %cst_3 = arith.constant 0.000000e+00 : f32
    %3 = arith.select %2, %cst, %cst_3 : f32
    %4 = arith.truncf %3 : f32 to bf16
    %5 = vector.broadcast %4 : bf16 to vector<1x18x3xbf16>
    %6 = arith.mulf %1, %5 : vector<1x18x3xbf16>
    %c0_4 = arith.constant 0 : index
    %c0_5 = arith.constant 0 : index
    %c0_6 = arith.constant 0 : index
    %c0_7 = arith.constant 0 : index
    %7 = vector.load %arg5[%c0_4, %c0_5, %c0_6, %c0_7] : memref<1x1x18x3xbf16, #tpu.memory_space<vmem>>, vector<1x1x18x3xbf16>
    %8 = vector.shape_cast %7 : vector<1x1x18x3xbf16> to vector<1x18x3xbf16>
    %c1_i32 = arith.constant 1 : i32
    %9 = arith.cmpi slt, %arg1, %c1_i32 : i32
    %cst_8 = arith.constant 1.000000e+00 : f32
    %cst_9 = arith.constant 0.000000e+00 : f32
    %10 = arith.select %9, %cst_8, %cst_9 : f32
    %11 = arith.truncf %10 : f32 to bf16
    %12 = vector.broadcast %11 : bf16 to vector<1x18x3xbf16>
    %13 = arith.mulf %8, %12 : vector<1x18x3xbf16>
    %c0_10 = arith.constant 0 : index
    %c0_11 = arith.constant 0 : index
    %c0_12 = arith.constant 0 : index
    %c0_13 = arith.constant 0 : index
    %14 = vector.load %arg3[%c0_10, %c0_11, %c0_12, %c0_13] : memref<1x8x18x3xbf16, #tpu.memory_space<vmem>>, vector<1x8x18x3xbf16>
    %15 = vector.shape_cast %14 : vector<1x8x18x3xbf16> to vector<8x18x3xbf16>
    %16 = tpu.concatenate %6, %15, %13 in 0 : vector<1x18x3xbf16>, vector<8x18x3xbf16>, vector<1x18x3xbf16> -> vector<10x18x3xbf16>
    %cst_14 = arith.constant 0.000000e+00 : f32
    %17 = vector.broadcast %cst_14 : f32 to vector<128x64xf32>
    %18 = vector.extract_strided_slice %16 {offsets = [0, 0, 0], sizes = [8, 16, 3], strides = [1, 1, 1]} : vector<10x18x3xbf16> to vector<8x16x3xbf16>
    %19 = vector.shape_cast %18 : vector<8x16x3xbf16> to vector<128x3xbf16>
    %c0_15 = arith.constant 0 : index
    %c0_16 = arith.constant 0 : index
    %c0_17 = arith.constant 0 : index
    %c0_18 = arith.constant 0 : index
    %20 = vector.load %arg6[%c0_15, %c0_16, %c0_17, %c0_18] : memref<3x3x3x64xbf16, #tpu.memory_space<vmem>>, vector<1x1x3x64xbf16>
    %21 = vector.shape_cast %20 : vector<1x1x3x64xbf16> to vector<3x64xbf16>
    %cst_19 = arith.constant dense<0.000000e+00> : vector<128x64xf32>
    %22 = tpu.matmul %19, %21, %cst_19 {dimension_numbers = #tpu.dot_dimension_numbers<[1], [0], [0], [1], [0, 0, 1, 1], [], []>} : vector<128x3xbf16>, vector<3x64xbf16>, vector<128x64xf32> -> vector<128x64xf32>
    %23 = arith.addf %17, %22 : vector<128x64xf32>
    %24 = vector.extract_strided_slice %16 {offsets = [0, 1, 0], sizes = [8, 16, 3], strides = [1, 1, 1]} : vector<10x18x3xbf16> to vector<8x16x3xbf16>
    %25 = vector.shape_cast %24 : vector<8x16x3xbf16> to vector<128x3xbf16>
    %c0_20 = arith.constant 0 : index
    %c1 = arith.constant 1 : index
    %c0_21 = arith.constant 0 : index
    %c0_22 = arith.constant 0 : index
    %26 = vector.load %arg6[%c0_20, %c1, %c0_21, %c0_22] : memref<3x3x3x64xbf16, #tpu.memory_space<vmem>>, vector<1x1x3x64xbf16>
    %27 = vector.shape_cast %26 : vector<1x1x3x64xbf16> to vector<3x64xbf16>
    %cst_23 = arith.constant dense<0.000000e+00> : vector<128x64xf32>
    %28 = tpu.matmul %25, %27, %cst_23 {dimension_numbers = #tpu.dot_dimension_numbers<[1], [0], [0], [1], [0, 0, 1, 1], [], []>} : vector<128x3xbf16>, vector<3x64xbf16>, vector<128x64xf32> -> vector<128x64xf32>
    %29 = arith.addf %23, %28 : vector<128x64xf32>
    %30 = vector.extract_strided_slice %16 {offsets = [0, 2, 0], sizes = [8, 16, 3], strides = [1, 1, 1]} : vector<10x18x3xbf16> to vector<8x16x3xbf16>
    %31 = vector.shape_cast %30 : vector<8x16x3xbf16> to vector<128x3xbf16>
    %c0_24 = arith.constant 0 : index
    %c2 = arith.constant 2 : index
    %c0_25 = arith.constant 0 : index
    %c0_26 = arith.constant 0 : index
    %32 = vector.load %arg6[%c0_24, %c2, %c0_25, %c0_26] : memref<3x3x3x64xbf16, #tpu.memory_space<vmem>>, vector<1x1x3x64xbf16>
    %33 = vector.shape_cast %32 : vector<1x1x3x64xbf16> to vector<3x64xbf16>
    %cst_27 = arith.constant dense<0.000000e+00> : vector<128x64xf32>
    %34 = tpu.matmul %31, %33, %cst_27 {dimension_numbers = #tpu.dot_dimension_numbers<[1], [0], [0], [1], [0, 0, 1, 1], [], []>} : vector<128x3xbf16>, vector<3x64xbf16>, vector<128x64xf32> -> vector<128x64xf32>
    %35 = arith.addf %29, %34 : vector<128x64xf32>
    %36 = vector.extract_strided_slice %16 {offsets = [1, 0, 0], sizes = [8, 16, 3], strides = [1, 1, 1]} : vector<10x18x3xbf16> to vector<8x16x3xbf16>
    %37 = vector.shape_cast %36 : vector<8x16x3xbf16> to vector<128x3xbf16>
    %c1_28 = arith.constant 1 : index
    %c0_29 = arith.constant 0 : index
    %c0_30 = arith.constant 0 : index
    %c0_31 = arith.constant 0 : index
    %38 = vector.load %arg6[%c1_28, %c0_29, %c0_30, %c0_31] : memref<3x3x3x64xbf16, #tpu.memory_space<vmem>>, vector<1x1x3x64xbf16>
    %39 = vector.shape_cast %38 : vector<1x1x3x64xbf16> to vector<3x64xbf16>
    %cst_32 = arith.constant dense<0.000000e+00> : vector<128x64xf32>
    %40 = tpu.matmul %37, %39, %cst_32 {dimension_numbers = #tpu.dot_dimension_numbers<[1], [0], [0], [1], [0, 0, 1, 1], [], []>} : vector<128x3xbf16>, vector<3x64xbf16>, vector<128x64xf32> -> vector<128x64xf32>
    %41 = arith.addf %35, %40 : vector<128x64xf32>
    %42 = vector.extract_strided_slice %16 {offsets = [1, 1, 0], sizes = [8, 16, 3], strides = [1, 1, 1]} : vector<10x18x3xbf16> to vector<8x16x3xbf16>
    %43 = vector.shape_cast %42 : vector<8x16x3xbf16> to vector<128x3xbf16>
    %c1_33 = arith.constant 1 : index
    %c1_34 = arith.constant 1 : index
    %c0_35 = arith.constant 0 : index
    %c0_36 = arith.constant 0 : index
    %44 = vector.load %arg6[%c1_33, %c1_34, %c0_35, %c0_36] : memref<3x3x3x64xbf16, #tpu.memory_space<vmem>>, vector<1x1x3x64xbf16>
    %45 = vector.shape_cast %44 : vector<1x1x3x64xbf16> to vector<3x64xbf16>
    %cst_37 = arith.constant dense<0.000000e+00> : vector<128x64xf32>
    %46 = tpu.matmul %43, %45, %cst_37 {dimension_numbers = #tpu.dot_dimension_numbers<[1], [0], [0], [1], [0, 0, 1, 1], [], []>} : vector<128x3xbf16>, vector<3x64xbf16>, vector<128x64xf32> -> vector<128x64xf32>
    %47 = arith.addf %41, %46 : vector<128x64xf32>
    %48 = vector.extract_strided_slice %16 {offsets = [1, 2, 0], sizes = [8, 16, 3], strides = [1, 1, 1]} : vector<10x18x3xbf16> to vector<8x16x3xbf16>
    %49 = vector.shape_cast %48 : vector<8x16x3xbf16> to vector<128x3xbf16>
    %c1_38 = arith.constant 1 : index
    %c2_39 = arith.constant 2 : index
    %c0_40 = arith.constant 0 : index
    %c0_41 = arith.constant 0 : index
    %50 = vector.load %arg6[%c1_38, %c2_39, %c0_40, %c0_41] : memref<3x3x3x64xbf16, #tpu.memory_space<vmem>>, vector<1x1x3x64xbf16>
    %51 = vector.shape_cast %50 : vector<1x1x3x64xbf16> to vector<3x64xbf16>
    %cst_42 = arith.constant dense<0.000000e+00> : vector<128x64xf32>
    %52 = tpu.matmul %49, %51, %cst_42 {dimension_numbers = #tpu.dot_dimension_numbers<[1], [0], [0], [1], [0, 0, 1, 1], [], []>} : vector<128x3xbf16>, vector<3x64xbf16>, vector<128x64xf32> -> vector<128x64xf32>
    %53 = arith.addf %47, %52 : vector<128x64xf32>
    %54 = vector.extract_strided_slice %16 {offsets = [2, 0, 0], sizes = [8, 16, 3], strides = [1, 1, 1]} : vector<10x18x3xbf16> to vector<8x16x3xbf16>
    %55 = vector.shape_cast %54 : vector<8x16x3xbf16> to vector<128x3xbf16>
    %c2_43 = arith.constant 2 : index
    %c0_44 = arith.constant 0 : index
    %c0_45 = arith.constant 0 : index
    %c0_46 = arith.constant 0 : index
    %56 = vector.load %arg6[%c2_43, %c0_44, %c0_45, %c0_46] : memref<3x3x3x64xbf16, #tpu.memory_space<vmem>>, vector<1x1x3x64xbf16>
    %57 = vector.shape_cast %56 : vector<1x1x3x64xbf16> to vector<3x64xbf16>
    %cst_47 = arith.constant dense<0.000000e+00> : vector<128x64xf32>
    %58 = tpu.matmul %55, %57, %cst_47 {dimension_numbers = #tpu.dot_dimension_numbers<[1], [0], [0], [1], [0, 0, 1, 1], [], []>} : vector<128x3xbf16>, vector<3x64xbf16>, vector<128x64xf32> -> vector<128x64xf32>
    %59 = arith.addf %53, %58 : vector<128x64xf32>
    %60 = vector.extract_strided_slice %16 {offsets = [2, 1, 0], sizes = [8, 16, 3], strides = [1, 1, 1]} : vector<10x18x3xbf16> to vector<8x16x3xbf16>
    %61 = vector.shape_cast %60 : vector<8x16x3xbf16> to vector<128x3xbf16>
    %c2_48 = arith.constant 2 : index
    %c1_49 = arith.constant 1 : index
    %c0_50 = arith.constant 0 : index
    %c0_51 = arith.constant 0 : index
    %62 = vector.load %arg6[%c2_48, %c1_49, %c0_50, %c0_51] : memref<3x3x3x64xbf16, #tpu.memory_space<vmem>>, vector<1x1x3x64xbf16>
    %63 = vector.shape_cast %62 : vector<1x1x3x64xbf16> to vector<3x64xbf16>
    %cst_52 = arith.constant dense<0.000000e+00> : vector<128x64xf32>
    %64 = tpu.matmul %61, %63, %cst_52 {dimension_numbers = #tpu.dot_dimension_numbers<[1], [0], [0], [1], [0, 0, 1, 1], [], []>} : vector<128x3xbf16>, vector<3x64xbf16>, vector<128x64xf32> -> vector<128x64xf32>
    %65 = arith.addf %59, %64 : vector<128x64xf32>
    %66 = vector.extract_strided_slice %16 {offsets = [2, 2, 0], sizes = [8, 16, 3], strides = [1, 1, 1]} : vector<10x18x3xbf16> to vector<8x16x3xbf16>
    %67 = vector.shape_cast %66 : vector<8x16x3xbf16> to vector<128x3xbf16>
    %c2_53 = arith.constant 2 : index
    %c2_54 = arith.constant 2 : index
    %c0_55 = arith.constant 0 : index
    %c0_56 = arith.constant 0 : index
    %68 = vector.load %arg6[%c2_53, %c2_54, %c0_55, %c0_56] : memref<3x3x3x64xbf16, #tpu.memory_space<vmem>>, vector<1x1x3x64xbf16>
    %69 = vector.shape_cast %68 : vector<1x1x3x64xbf16> to vector<3x64xbf16>
    %cst_57 = arith.constant dense<0.000000e+00> : vector<128x64xf32>
    %70 = tpu.matmul %67, %69, %cst_57 {dimension_numbers = #tpu.dot_dimension_numbers<[1], [0], [0], [1], [0, 0, 1, 1], [], []>} : vector<128x3xbf16>, vector<3x64xbf16>, vector<128x64xf32> -> vector<128x64xf32>
    %71 = arith.addf %65, %70 : vector<128x64xf32>
    %c0_58 = arith.constant 0 : index
    %c0_59 = arith.constant 0 : index
    %72 = vector.load %arg7[%c0_58, %c0_59] : memref<1x64xf32, #tpu.memory_space<vmem>>, vector<1x64xf32>
    %73 = vector.broadcast %72 : vector<1x64xf32> to vector<128x64xf32>
    %74 = arith.addf %71, %73 : vector<128x64xf32>
    %cst_60 = arith.constant 0.000000e+00 : f32
    %75 = vector.broadcast %cst_60 : f32 to vector<128x64xf32>
    %76 = arith.maximumf %74, %75 : vector<128x64xf32>
    %77 = vector.shape_cast %76 : vector<128x64xf32> to vector<8x16x64xf32>
    %78 = arith.truncf %77 : vector<8x16x64xf32> to vector<8x16x64xbf16>
    %c0_61 = arith.constant 0 : index
    %c0_62 = arith.constant 0 : index
    %c0_63 = arith.constant 0 : index
    %c0_64 = arith.constant 0 : index
    %79 = vector.load %arg8[%c0_61, %c0_62, %c0_63, %c0_64] : memref<1x8x16x64xbf16, #tpu.memory_space<vmem>>, vector<1x8x16x64xbf16>
    %80 = vector.shape_cast %79 : vector<1x8x16x64xbf16> to vector<8x16x64xbf16>
    %81 = vector.shape_cast %78 : vector<8x16x64xbf16> to vector<1x8x16x64xbf16>
    tpu.vector_store %arg8[%c0_61, %c0_62, %c0_63, %c0_64], %81 {strides = array<i32>} : memref<1x8x16x64xbf16, #tpu.memory_space<vmem>>, vector<1x8x16x64xbf16>,
    return
  }
  func.func @transform_0(%arg0: i32, %arg1: i32, %arg2: i32) -> (i32, i32, i32, i32) {
    %c0_i32 = arith.constant 0 : i32
    %c0_i32_0 = arith.constant 0 : i32
    %c0_i32_1 = arith.constant 0 : i32
    return %arg0, %arg1, %c0_i32, %c0_i32_0 : i32, i32, i32, i32
  }
  func.func @transform_1(%arg0: i32, %arg1: i32, %arg2: i32) -> (i32, i32, i32, i32) {
    %c8_i32 = arith.constant 8 : i32
    %0 = arith.muli %arg1, %c8_i32 : i32
    %c1_i32 = arith.constant 1 : i32
    %1 = arith.subi %0, %c1_i32 : i32
    %c0_i32 = arith.constant 0 : i32
    %2 = arith.maxsi %1, %c0_i32 : i32
    %c0_i32_0 = arith.constant 0 : i32
    %c0_i32_1 = arith.constant 0 : i32
    %c0_i32_2 = arith.constant 0 : i32
    return %arg0, %2, %c0_i32_0, %c0_i32_1 : i32, i32, i32, i32
  }
  func.func @transform_2(%arg0: i32, %arg1: i32, %arg2: i32) -> (i32, i32, i32, i32) {
    %c8_i32 = arith.constant 8 : i32
    %0 = arith.muli %arg1, %c8_i32 : i32
    %c8_i32_0 = arith.constant 8 : i32
    %1 = arith.addi %0, %c8_i32_0 : i32
    %c15_i32 = arith.constant 15 : i32
    %2 = arith.minsi %1, %c15_i32 : i32
    %c0_i32 = arith.constant 0 : i32
    %c0_i32_1 = arith.constant 0 : i32
    %c0_i32_2 = arith.constant 0 : i32
    return %arg0, %2, %c0_i32, %c0_i32_1 : i32, i32, i32, i32
  }
  func.func @transform_3(%arg0: i32, %arg1: i32, %arg2: i32) -> (i32, i32, i32, i32) {
    %c0_i32 = arith.constant 0 : i32
    %c0_i32_0 = arith.constant 0 : i32
    %c0_i32_1 = arith.constant 0 : i32
    %c0_i32_2 = arith.constant 0 : i32
    return %c0_i32, %c0_i32_0, %c0_i32_1, %arg2 : i32, i32, i32, i32
  }
  func.func @transform_4(%arg0: i32, %arg1: i32, %arg2: i32) -> (i32, i32) {
    %c0_i32 = arith.constant 0 : i32
    %c0_i32_0 = arith.constant 0 : i32
    return %c0_i32, %arg2 : i32, i32
  }
  func.func @transform_5(%arg0: i32, %arg1: i32, %arg2: i32) -> (i32, i32, i32, i32) {
    %c0_i32 = arith.constant 0 : i32
    %c0_i32_0 = arith.constant 0 : i32
    return %arg0, %arg1, %c0_i32, %arg2 : i32, i32, i32, i32
  }
}

</mosaic_0001>

<bundles_post_ra>
// kernel: tpu_custom_call.1
= control target key start
LH: loop header
LB: loop body
LE: loop exit
PB: predicated region body
PF: predicated region fallthrough
CT: control target
= control target key end

     0   :  { %s3942_s0 = inlined_call_operand.vmem [shape: bf16[2,16,18,3], index: 0, kind: input, shape index: {}]   ;;  %s3943_s1 = inlined_call_operand.vmem [shape: bf16[2,16,18,3], index: 1, kind: input, shape index: {}]   ;;  %s3944_s2 = inlined_call_operand.vmem [shape: bf16[2,16,18,3], index: 2, kind: input, shape index: {}]   ;;  %s3945_s3 = inlined_call_operand.vmem [shape: bf16[3,3,3,64], index: 3, kind: input, shape index: {}]   ;;  %s3946_s4 = inlined_call_operand.vmem [shape: f32[1,64], index: 4, kind: input, shape index: {}]   ;;  %s3947_s5 = inlined_call_operand.hbm [shape: bf16[2,16,16,64], index: 5, kind: output, shape index: {}]  }
   0x1   :  { %3949 = sst [smem:[#allocation5_spill]] %s3942_s0 }
   0x2   :  { %10 = vsyncpa [#allocation3], 0 }
   0x3   :  { %12 = vsyncpa [#allocation3 + $0x1], 0  ;;  %s3127_s18 = smov 0   ;;  %s3129_s19 = smov 0  }
   0x4   :  { %s3131_s20 = smov 0   ;;  %s3133_s21 = smov 0  }
   0x5   :  { %s3135_s22 = smov 0   ;;  %s3137_s23 = smov 0  }
   0x6   :  { %s3139_s24 = smov 0   ;;  %s3141_s25 = smov 0  }
   0x7 LB: > { %s2346_s26 = sadd.s32 4294967295, %s3091_s25   ;;  %s2347_s27 = sadd.s32 4294967294, %s3091_s25   ;;  %s3091_s25 = sphi %s3141_s25, %s18_s25   ;;  %s3087_s24 = sphi %s3139_s24, %s3965_s24   ;;  %s3083_s23 = sphi %s3137_s23, %s3964_s23   ;;  %s3079_s22 = sphi %s3135_s22, %s3963_s22   ;;  %s3075_s21 = sphi %s3133_s21, %s3962_s21   ;;  %s3071_s20 = sphi %s3131_s20, %s3961_s20   ;;  %s3067_s19 = sphi %s3129_s19, %s3960_s19   ;;  %s3063_s18 = sphi %s3127_s18, %s3959_s18  }
   0x8   : > { %s33_s28 = sadd.s32 1, %s3083_s23  ;;  %s37_s29 = sadd.s32 1, %s3087_s24 }
   0x9   : > { %p35_p0 = scmp.ge.s32.totalorder %s33_s28, 2  ;;  %p210_p1 = scmp.ne.s32.totalorder %s3071_s20, %s3067_s19 }
   0xa   : > { %p211_p2 = scmp.eq.s32.totalorder %s2346_s26, 3  ;;  %p216_p5 = scmp.ne.s32.totalorder %s3067_s19, %s3063_s18 }
   0xb   : > { %s3967_s28 = smov (%p35_p0, %s33_s28), 0  ;;  %s3969_s29 = smov (!%p35_p0, %s37_s29), %s3087_s24 }
   0xc   : > { %s194_s30 = ssub.s32 %s3083_s23, %s3967_s28  ;;  %p3178_p3 = por %p211_p2, %p210_p1 }
   0xd   : > { %p39_p4 = scmp.ge.s32.totalorder %s3969_s29, 2  ;;  %p217_p6 = scmp.eq.s32.totalorder %s2347_s27, 3 }
   0xe   : > { %p2358_p7 = scmp.ge.s32.totalorder %s3091_s25, 1  ;;  %p302_p9 = scmp.lt.s32.totalorder %s3091_s25, 5 }
   0xf   : > { %s3971_s29 = smov (%p39_p4, %s3969_s29), 0  ;;  %p3187_p8 = por %p217_p6, %p216_p5 }
  0x10   : > { %s193_s8 = ssub.s32 %s3087_s24, %s3971_s29  ;;  %s200_s9 = sadd.s32 1, %s3071_s20 }
  0x11   : > { %s195_s10 = sor.u32 %s194_s30, %s193_s8  ;;  %p303_p10 = pnand %p2358_p7, %p302_p9 }
  0x12   : > { %p198_p11 = scmp.eq.s32.totalorder %s195_s10, 0  ;;  %vm737_vm0 = vcmask (!%p303_p10), 1040384   ;;  %vm738_vm1 = vcmask (!%p303_p10), 1041408   ;;  %v2443_v0 = vld [vmem:[%s3945_s3 + $0x8] sm:$0x3] (!%p303_p10)  ;;  %s3202_s14 = sshll.u32 (!%p303_p10), %s3075_s21, 3 }
  0x13   : > { %306 = sbr.rel (%p303_p10) target bundleno = 438 (0x1b6), region = 40  ;;  %v3093_v1 = vmov (!%p303_p10), 65535   ;;  %p369_p12 = scmp.lt.s32.totalorder (!%p303_p10), %s3079_s22, 1  ;;  %v2375_v4 = vld [vmem:[%s3945_s3 + $0x2] sm:$0x3] (!%p303_p10)  ;;  %vm712_vm5 = vcmask (!%p303_p10), 23552  }
  0x14   : > { %s3196_s11 = scalar_select %p198_p11, %s3071_s20, %s200_s9  }
  0x15   : > { %v739_v2 = vsel (!%p303_p10), %vm737_vm0, 4294967295, %v3093_v1  ;;  %p371_p13 = scmp.lt.s32.totalorder (!%p303_p10), %s3202_s14, 15  ;;  %s3212_s17 = sadd.s32 (!%p303_p10), 4294967295, %s3202_s14  ;;  %v490_v7 = vld [vmem:[%s3945_s3] sm:$0x3] (!%p303_p10)  ;;  %vm1013_vm6 = vcmask (!%p303_p10), 1042432  }
  0x16   : > { %v3206_v3 = vsel (!%p303_p10), %vm738_vm1, %v739_v2, 0  ;;  %v2454_v8 = vld [vmem:[%s3945_s3 + $0xa] sm:$0x3] (!%p303_p10)  ;;  %p381_p0 = scmp.gt.s32.totalorder (!%p303_p10), %s3212_s17, 0  ;;  %p2364_p1 = scmp.lt.s32.totalorder (!%p303_p10), %s3212_s17, 15  ;;  %vm1014_vm7 = vcmask (!%p303_p10), 1046532  }
  0x17   : > { %v3215_v5 = vand.u32 (!%p303_p10), %v2443_v0, %v3206_v3  ;;  %v742_v6 = vand.u32 (!%p303_p10), %v2375_v4, %v3206_v3  ;;  %v3227_v9 = vand.u32 (!%p303_p10), %v3206_v3, %v490_v7  ;;  %v3230_v10 = vand.u32 (!%p303_p10), %v2454_v8, %v3206_v3  ;;  %s3952_s0 = sld [smem:[#allocation5_spill]] (!%p303_p10)  ;;  %p425_p2 = scmp.gt.s32.totalorder (!%p303_p10), %s3075_s21, 0  ;;  %v2464_v22 = vld [vmem:[%s3945_s3 + $0xc] sm:$0x3] (!%p303_p10)  ;;  %v2416_v27 = vld [vmem:[%s3945_s3 + $0x4] sm:$0x3] (!%p303_p10)  ;;  %vm3416_vm8 = vmor (!%p303_p10), %vm1013_vm6, %vm1014_vm7 }
  0x18   : > { %vm491_vm2 = vsmask.f32 (!%p303_p10), 3328  ;;  %vm492_vm3 = vsmask.f32 (!%p303_p10), 7440  ;;  %v3309_v44 = vand.u32 (!%p303_p10), %v2464_v22, %v3206_v3  ;;  %v2474_v45 = vld [vmem:[%s3945_s3 + $0xe] sm:$0x3] (!%p303_p10)  ;;  %v3316_v49 = vand.u32 (!%p303_p10), %v2416_v27, %v3206_v3 }
  0x19   : > { %2691 = vmatprep.subr.bf16.mxu0 (!%p303_p10), %v3215_v5  ;;  %2619 = vmatprep.subr.bf16.mxu1 (!%p303_p10), %v742_v6  ;;  %vm3300_vm4 = vmor (!%p303_p10), %vm491_vm2, %vm492_vm3  ;;  %v3342_v60 = vand.u32 (!%p303_p10), %v2474_v45, %v3206_v3  ;;  %p447_p6 = scmp.lt.s32.totalorder (!%p303_p10), %s3075_s21, 1  ;;  %vm2153_vm9 = vcmask (!%p303_p10), 519168  }
  0x1a   : > { %s370_s26 = scalar_select %p369_p12, %s3079_s22, 1  ;;  %2692 = vmatpush3.bf16.msra.mxu0 %v3215_v5  ;;  %2620 = vmatpush3.bf16.msra.mxu1 %v742_v6 }
  0x1b   : > { %s372_s10 = scalar_select %p371_p13, %s3202_s14, 15  ;;  %2637 = vmatprep.subr.bf16.mxu1 %v3227_v9  ;;  %2709 = vmatprep.subr.bf16.mxu0 %v3230_v10 }
  0x1c   : > { %s3233_s12 = smul.u32 48, %s370_s26 }
  0x1d   : > { %s2911_s13 = smul.u32 3, %s372_s10 }
  0x1e   : > { %s382_s15 = scalar_select %p381_p0, %s3212_s17, 0 }
  0x1f   : > { %s375_s16 = sadd.s32 %s3233_s12, %s2911_s13  ;;  %s3948_s13 = sadd.s32 8, %s3202_s14 }
  0x20   : > { %s2361_s27 = sshll.u32 %s375_s16, 2  ;;  %s3973_s15 = smov (!%p2364_p1, %s382_s15), 15 }
  0x21   : > { %s3245_s26 = scalar_lea.vmem %s3952_s0, %s2361_s27  ;;  %s2913_s17 = smul.u32 3, %s3973_s15 }
  0x22   : > { %v3249_v11 = vld [vmem:[%s3245_s26] sm:$0xf]  ;;  %v3252_v12 = vld [vmem:[%s3245_s26 + $0x4] sm:$0xf]  ;;  %v3255_v13 = vld [vmem:[%s3245_s26 + $0x8] sm:$0x1] }
  0x23   : > { %v519_v14 = vshrl.u32 %v3249_v11, 16  ;;  %v522_v15 = vshll.u32 %v3249_v11, 16  ;;  %v528_v16 = vshll.u32 %v3252_v12, 16  ;;  %v532_v17 = vshrl.u32 %v3252_v12, 16  ;;  %v3262_v18 = vld [vmem:[%s3245_s26 + $0xc] sm:$0xf]  ;;  %s389_s9 = sadd.s32 %s2913_s17, %s3233_s12 }
  0x24   : > { %v538_v19 = vshll.u32 %v3255_v13, 16  ;;  %v3266_v20 = vld [vmem:[%s3245_s26 + $0x10] sm:$0xf]  ;;  %v3269_v21 = vld [vmem:[%s3245_s26 + $0x14] sm:$0x1]  ;;  %v543_v29 = vshrl.u32 %v3262_v18, 16 }
  0x25   : > { %v521_v23 = vrot.slane %v519_v14, 4  ;;  %v524_v24 = vrot.slane %v522_v15, 5  ;;  %v530_v25 = vrot.slane %v528_v16, 5  ;;  %v534_v26 = vrot.slane %v532_v17, 4  ;;  %s3285_s30 = scalar_select %p425_p2, 1.0, 0.0 }
  0x26   : > { %v540_v28 = vrot.slane %v538_v19, 5  ;;  %v546_v30 = vshll.u32 %v3262_v18, 16  ;;  %v552_v31 = vshll.u32 %v3266_v20, 16  ;;  %v556_v34 = vshrl.u32 %v3266_v20, 16  ;;  %v3290_v36 = vld [vmem:[%s3245_s26 + $0x18] sm:$0xf] }
  0x27   : > { %v525_v32 = vor.u32 %v524_v24, %v521_v23  ;;  %v535_v33 = vor.u32 %v534_v26, %v530_v25  ;;  %v562_v35 = vshll.u32 %v3269_v21, 16  ;;  %p3294_p4 = scmp.lt.s32.totalorder %s3948_s13, 15  ;;  %v545_v38 = vrot.slane %v543_v29, 4  ;;  %p428_p5 = scmp.ne.f32.partialorder %s3285_s30, %s3285_s30  ;;  %v3329_v53 = vld [vmem:[%s3245_s26 + $0x1c] sm:$0xf] }
  0x28   : > { %v548_v39 = vrot.slane %v546_v30, 5  ;;  %v554_v40 = vrot.slane %v552_v31, 5  ;;  %s429_s15 = sshrl.u32 %s3285_s30, 16  ;;  %v558_v43 = vrot.slane %v556_v34, 4  ;;  %s2369_s13 = sshll.u32 %s389_s9, 2  ;;  %v567_v48 = vshrl.u32 %v3290_v36, 16 }
  0x29   : > { %v526_v41 = vrot.slane %v525_v32, 4  ;;  %v536_v42 = vrot.slane %v535_v33, 4  ;;  %s430_s10 = sand.u32 1, %s429_s15  ;;  %v564_v47 = vrot.slane %v562_v35, 5  ;;  %s3325_s9 = scalar_lea.vmem %s3943_s1, %s2369_s13  ;;  %v3332_v54 = vld [vmem:[%s3245_s26 + $0x20] sm:$0x1] }
  0x2a   : > { %v549_v46 = vor.u32 %v548_v39, %v545_v38  ;;  %s431_s0 = sadd.s32 32767, %s430_s10  ;;  %v559_v52 = vor.u32 %v558_v43, %v554_v40  ;;  %v570_v55 = vshll.u32 %v3290_v36, 16  ;;  %v1028_v57 = vrot.slane %v3255_v13, 5  ;;  %v3339_v59 = vld [vmem:[%s3245_s26 + $0x24] sm:$0xf] }
  0x2b   : > { %v531_v50 = vsel %vm3300_vm4, %v526_v41, %v530_v25  ;;  %v541_v51 = vsel %vm3300_vm4, %v536_v42, %v540_v28  ;;  %s432_s10 = sadd.s32 %s431_s0, %s3285_s30  ;;  %v1032_v62 = vrot.slane %v3266_v20, 5  ;;  %v569_v63 = vrot.slane %v567_v48, 4  ;;  %v422_v2 = vld [vmem:[%s3325_s9] sm:$0xf]  ;;  %v423_v4 = vld [vmem:[%s3325_s9 + $0x4] sm:$0xf] }
  0x2c   : > { %v3335_v56 = vcombine.low %v531_v50, %v541_v51  ;;  %v550_v58 = vrot.slane %v549_v46, 4  ;;  %s433_s16 = sand.u32 4294901760, %s432_s10  ;;  %v560_v61 = vrot.slane %v559_v52, 4  ;;  %v572_v0 = vrot.slane %v570_v55, 5  ;;  %v3358_v14 = vld [vmem:[%s3245_s26 + $0x28] sm:$0xf] }
  0x2d   : > { %s3975_s16 = smov (%p428_p5, %s433_s16), 2143289344  ;;  %v576_v6 = vshll.u32 %v3329_v53, 16  ;;  %v580_v7 = vshrl.u32 %v3329_v53, 16  ;;  %v586_v8 = vshll.u32 %v3332_v54, 16  ;;  %s3956_s0 = sadd.s32 8, %s3202_s14  ;;  %v591_v19 = vshrl.u32 %v3339_v59, 16 }
  0x2e   : > { %2693 = vmatprep.mubr.msk.bf16.mxu0 %vm712_vm5, %v3335_v56  ;;  %v555_v1 = vsel %vm3300_vm4, %v550_v58, %v554_v40  ;;  %s3977_s0 = smov (!%p3294_p4, %s3956_s0), 15  ;;  %v565_v15 = vsel %vm3300_vm4, %v560_v61, %v564_v47  ;;  %s436_s13 = sshrl.u32 %s3975_s16, 16  ;;  %v573_v16 = vor.u32 %v572_v0, %v569_v63  ;;  %v3369_v17 = vld [vmem:[%s3245_s26 + $0x2c] sm:$0x1]  ;;  %v594_v22 = vshll.u32 %v3339_v59, 16 }
  0x2f   : > { %v3373_v23 = vcombine.low %v555_v1, %v565_v15  ;;  %v424_v24 = vld [vmem:[%s3325_s9 + $0x8] sm:$0x1]  ;;  %s437_s30 = sshll.u32 %s436_s13, 16  ;;  %v578_v25 = vrot.slane %v576_v6, 5  ;;  %v582_v26 = vrot.slane %v580_v7, 4  ;;  %v588_v27 = vrot.slane %v586_v8, 5 }
  0x30   : > { %s438_s14 = sor.u32 %s437_s30, %s436_s13  ;;  %v574_v28 = vrot.slane %v573_v16, 4  ;;  %v593_v29 = vrot.slane %v591_v19, 4  ;;  %v596_v30 = vrot.slane %v594_v22, 5  ;;  %v600_v31 = vshll.u32 %v3358_v14, 16  ;;  %s3979_s0 = smov (!%p3294_p4, %s3977_s0), 15 }
  0x31   : > { %2694 = vmatmul.mubr.msk.bf16.vlgmr.msra.gmra.mrb[0].mxu0 %vm712_vm5, %v3373_v23  ;;  %v439_v32 = vstv %s438_s14  ;;  %v583_v33 = vor.u32 %v582_v26, %v578_v25  ;;  %v604_v34 = vshrl.u32 %v3358_v14, 16  ;;  %v610_v35 = vshll.u32 %v3369_v17, 16  ;;  %s3402_s8 = smul.u32 3, %s3979_s0  ;;  %v3409_v7 = vld [vmem:[%s3245_s26 + $0x30] sm:$0xf] }
  0x32   : > { %v3381_v38 = vmul.bf16 %v439_v32, %v422_v2  ;;  %v3383_v39 = vmul.bf16 %v439_v32, %v423_v4  ;;  %v3385_v40 = vmul.bf16 %v439_v32, %v424_v24  ;;  %2710 = vmatpush3.bf16.msra.mxu0 %v3230_v10  ;;  %v579_v41 = vsel %vm3300_vm4, %v574_v28, %v578_v25  ;;  %s3442_s17 = scalar_select %p447_p6, 1.0, 0.0 }
  0x33   : > { %v584_v42 = vrot.slane %v583_v33, 4  ;;  %v597_v43 = vor.u32 %v596_v30, %v593_v29  ;;  %v602_v45 = vrot.slane %v600_v31, 5  ;;  %v606_v46 = vrot.slane %v604_v34, 4  ;;  %2727 = vmatprep.subr.bf16.mxu0 %v3309_v44  ;;  %s406_s27 = sadd.s32 %s3402_s8, %s3233_s12  ;;  %s2537_s12 = sshll.u32 %s3075_s21, 4 }
  0x34   : > { %v495_v47 = vshrl.u32 %v3381_v38, 16  ;;  %v498_v48 = vshll.u32 %v3381_v38, 16  ;;  %v504_v50 = vshll.u32 %v3383_v39, 16  ;;  %v508_v10 = vshrl.u32 %v3383_v39, 16  ;;  %s451_s15 = sshrl.u32 %s3442_s17, 16  ;;  %p450_p7 = scmp.ne.f32.partialorder %s3442_s17, %s3442_s17 }
  0x35   : > { %v1035_v51 = vrot.slane %v3269_v21, 5  ;;  %v514_v52 = vshll.u32 %v3385_v40, 16  ;;  %v589_v55 = vsel %vm3300_vm4, %v584_v42, %v588_v27  ;;  %v598_v58 = vrot.slane %v597_v43, 4  ;;  %s3468_s9 = sand.u32 1, %s451_s15  ;;  %s2374_s30 = sshll.u32 %s406_s27, 2 }
  0x36   : > { %v497_v61 = vrot.slane %v495_v47, 4  ;;  %v500_v63 = vrot.slane %v498_v48, 5  ;;  %v506_v0 = vrot.slane %v504_v50, 5  ;;  %v510_v1 = vrot.slane %v508_v10, 4  ;;  %v3453_v47 = vld [vmem:[%s3245_s26 + $0x38] sm:$0x1]  ;;  %s408_s8 = scalar_lea.vmem %s3944_s2, %s2374_s30 }
  0x37   : > { %v516_v2 = vrot.slane %v514_v52, 5  ;;  %v3404_v4 = vcombine.low %v579_v41, %v589_v55  ;;  %v603_v6 = vsel %vm3300_vm4, %v598_v58, %v602_v45  ;;  %v607_v21 = vor.u32 %v606_v46, %v602_v45  ;;  %v3438_v41 = vld [vmem:[%s3245_s26 + $0x34] sm:$0xf]  ;;  %s453_s10 = sadd.s32 32767, %s3468_s9 }
  0x38   : > { %v501_v8 = vor.u32 %v500_v63, %v497_v61  ;;  %v511_v15 = vor.u32 %v510_v1, %v506_v0  ;;  %v612_v16 = vrot.slane %v610_v35, 5  ;;  %v2409_v22 = vrot.slane %v3249_v11, 9  ;;  %s3508_s16 = sadd.s32 %s453_s10, %s3442_s17 }
  0x39   : > { %2697 = vmatprep.mubr.msk.bf16.mxu0 %vm712_vm5, %v3404_v4  ;;  %v608_v24 = vrot.slane %v607_v21, 4  ;;  %v1025_v25 = vrot.slane %v3252_v12, 5  ;;  %v2410_v26 = vrot.slane %v3262_v18, 9  ;;  %v1034_v27 = vrot.slane %v1032_v62, 4  ;;  %s455_s0 = sand.u32 4294901760, %s3508_s16  ;;  %s365_s16 = sand.u32 1, %s3067_s19  }
  0x3a   : > { %v502_v28 = vrot.slane %v501_v8, 4  ;;  %v512_v29 = vrot.slane %v511_v15, 4  ;;  %v615_v30 = vshrl.u32 %v3409_v7, 16  ;;  %v618_v31 = vshll.u32 %v3409_v7, 16  ;;  %s3981_s0 = smov (%p450_p7, %s455_s0), 2143289344  ;;  %s2359_s30 = sshll.u32 %s365_s16, 6 }
  0x3b   : > { %v613_v32 = vsel %vm3300_vm4, %v608_v24, %v612_v16  ;;  %v1026_v33 = vsel %vm3416_vm8, %v2409_v22, %v1025_v25  ;;  %v1027_v34 = vrot.slane %v1025_v25, 4  ;;  %v1033_v35 = vsel %vm3416_vm8, %v2410_v26, %v1032_v62  ;;  %v3492_v25 = vld [vmem:[%s3245_s26 + $0x40] sm:$0xf]  ;;  %s458_s13 = sshrl.u32 %s3981_s0, 16  ;;  %s3890_s9 = scalar_lea.sflag [#allocation3], %s365_s16 }
  0x3c   : > { %v507_v42 = vsel %vm3300_vm4, %v502_v28, %v506_v0  ;;  %v517_v43 = vsel %vm3300_vm4, %v512_v29, %v516_v2  ;;  %v3448_v45 = vcombine.low %v603_v6, %v613_v32  ;;  %v1036_v46 = vsel %vm3416_vm8, %v1034_v27, %v1035_v51  ;;  %v3476_v0 = vld [vmem:[%s3245_s26 + $0x3c] sm:$0xf]  ;;  %v3501_v29 = vld [vmem:[%s3245_s26 + $0x44] sm:$0x1]  ;;  %s459_s14 = sshll.u32 %s458_s13, 16  ;;  %s3094_s0 = smov [#allocation2]  }
  0x3d   : > { %v2376_v62 = vcombine.low %v507_v42, %v517_v43  ;;  %v1029_v48 = vsel %vm3416_vm8, %v1027_v34, %v1028_v57  ;;  %v3459_v50 = vcombine.low %v1033_v35, %v1036_v46  ;;  %v617_v10 = vrot.slane %v615_v30, 4  ;;  %s460_s27 = sor.u32 %s459_s14, %s458_s13  ;;  %s3832_s14 = scalar_lea.vmem [#allocation2], %s2359_s30 }
  0x3e   : > { %2698 = vmatmul.mubr.msk.bf16.gmra.mrb[4].mxu0 %vm712_vm5, %v3448_v45  ;;  %v3464_v52 = vcombine.low %v1026_v33, %v1029_v48  ;;  %v620_v55 = vrot.slane %v618_v31, 5  ;;  %v624_v51 = vshll.u32 %v3438_v41, 16  ;;  %v628_v58 = vshrl.u32 %v3438_v41, 16  ;;  %s3001_s13 = sshll.u32 %s3094_s0, 4  ;;  %s3002_s13 = int_to_ptr.vmem [resolvable:$false] %s3001_s13 }
  0x3f   : > { %2621 = vmatprep.mubr.msk.bf16.mxu1 %vm712_vm5, %v2376_v62  ;;  %v634_v13 = vshll.u32 %v3453_v47, 16  ;;  %v2411_v57 = vrot.slane %v3290_v36, 9  ;;  %v1039_v61 = vrot.slane %v3329_v53, 5  ;;  %v1042_v63 = vrot.slane %v3332_v54, 5  ;;  %v3519_v62 = vld [vmem:[%s3245_s26 + $0x4c] sm:$0xf] }
  0x40   : > { %2622 = vmatmul.mubr.msk.bf16.vlgmr.msra.gmra.mrb[0].mxu1 %vm712_vm5, %v3335_v56  ;;  %2711 = vmatprep.mubr.msk.bf16.mxu0 %vm712_vm5, %v3464_v52  ;;  %v621_v1 = vor.u32 %v620_v55, %v617_v10  ;;  %v626_v2 = vrot.slane %v624_v51, 5  ;;  %v630_v6 = vrot.slane %v628_v58, 4  ;;  %v2412_v21 = vrot.slane %v3339_v59, 9  ;;  %v3531_v51 = vld [vmem:[%s3245_s26 + $0x50] sm:$0x1]  ;;  %s3003_s30 = scalar_lea.vmem %s3002_s13, 2048 }
  0x41   : > { %2638 = vmatpush3.bf16.msra.mxu1 %v3227_v9  ;;  %2625 = vmatprep.mubr.msk.bf16.mxu1 %vm712_vm5, %v3373_v23  ;;  %v636_v54 = vrot.slane %v634_v13, 5  ;;  %v1040_v56 = vsel %vm3416_vm8, %v2411_v57, %v1039_v61  ;;  %v1041_v8 = vrot.slane %v1039_v61, 4  ;;  %v1046_v15 = vrot.slane %v3358_v14, 5 }
  0x42   : > { %v622_v16 = vrot.slane %v621_v1, 4  ;;  %v631_v22 = vor.u32 %v630_v6, %v626_v2  ;;  %v1049_v24 = vrot.slane %v3369_v17, 5  ;;  %v639_v9 = vshrl.u32 %v3476_v0, 16  ;;  %2655 = vmatprep.subr.bf16.mxu1 %v3316_v49  ;;  %v3505_v17 = vld [vmem:[%s3245_s26 + $0x48] sm:$0xf] }
  0x43   : > { %v1043_v26 = vsel %vm3416_vm8, %v1041_v8, %v1042_v63  ;;  %v1047_v27 = vsel %vm3416_vm8, %v2412_v21, %v1046_v15  ;;  %v1048_v28 = vrot.slane %v1046_v15, 4  ;;  %v642_v30 = vshll.u32 %v3476_v0, 16 }
  0x44   : > { %v627_v31 = vsel %vm3300_vm4, %v622_v16, %v626_v2  ;;  %v632_v32 = vrot.slane %v631_v22, 4  ;;  %v3512_v33 = vcombine.low %v1040_v56, %v1043_v26  ;;  %v641_v34 = vrot.slane %v639_v9, 4 }
  0x45   : > { %v1050_v35 = vsel %vm3416_vm8, %v1048_v28, %v1049_v24  ;;  %v644_v42 = vrot.slane %v642_v30, 5  ;;  %v648_v43 = vshll.u32 %v3492_v25, 16  ;;  %v652_v46 = vshrl.u32 %v3492_v25, 16 }
  0x46   : > { %2712 = vmatmul.mubr.msk.bf16.vlgmr.msra.gmra.mrb[0].mxu0 %vm712_vm5, %v3459_v50  ;;  %v637_v48 = vsel %vm3300_vm4, %v632_v32, %v636_v54  ;;  %v3527_v10 = vcombine.low %v1047_v27, %v1050_v35  ;;  %v658_v55 = vshll.u32 %v3501_v29, 16  ;;  %v663_v58 = vshrl.u32 %v3505_v17, 16 }
  0x47   : > { %v3535_v13 = vcombine.low %v627_v31, %v637_v48  ;;  %2728 = vmatpush3.bf16.msra.mxu0 %v3309_v44  ;;  %2715 = vmatprep.mubr.msk.bf16.mxu0 %vm712_vm5, %v3512_v33  ;;  %v645_v57 = vor.u32 %v644_v42, %v641_v34  ;;  %v650_v61 = vrot.slane %v648_v43, 5  ;;  %v654_v63 = vrot.slane %v652_v46, 4 }
  0x48   : > { %2626 = vmatmul.mubr.msk.bf16.gmra.mrb[4].mxu1 %vm712_vm5, %v3404_v4  ;;  %v660_v1 = vrot.slane %v658_v55, 5  ;;  %v665_v2 = vrot.slane %v663_v58, 4  ;;  %v666_v6 = vshll.u32 %v3505_v17, 16  ;;  %v672_v21 = vshll.u32 %v3519_v62, 16  ;;  %2745 = vmatprep.subr.bf16.mxu0 %v3342_v60 }
  0x49   : > { %2629 = vmatprep.mubr.msk.bf16.mxu1 %vm712_vm5, %v3448_v45  ;;  %v646_v44 = vrot.slane %v645_v57, 4  ;;  %v655_v54 = vor.u32 %v654_v63, %v650_v61  ;;  %v676_v56 = vshrl.u32 %v3519_v62, 16  ;;  %v682_v8 = vshll.u32 %v3531_v51, 16 }
  0x4a   : > { %v668_v15 = vrot.slane %v666_v6, 5  ;;  %v674_v16 = vrot.slane %v672_v21, 5  ;;  %v2413_v22 = vrot.slane %v3409_v7, 9  ;;  %v1053_v24 = vrot.slane %v3438_v41, 5  ;;  %v3581_v6 = vld [vmem:[%s3245_s26 + $0x58] sm:$0xf] }
  0x4b   : > { %v651_v9 = vsel %vm3300_vm4, %v646_v44, %v650_v61  ;;  %v656_v26 = vrot.slane %v655_v54, 4  ;;  %v678_v27 = vrot.slane %v676_v56, 4  ;;  %v684_v28 = vrot.slane %v682_v8, 5  ;;  %v3588_v54 = vld [vmem:[%s3245_s26 + $0x5c] sm:$0x1] }
  0x4c   : > { %v669_v30 = vor.u32 %v668_v15, %v665_v2  ;;  %v1054_v31 = vsel %vm3416_vm8, %v2413_v22, %v1053_v24  ;;  %v1055_v32 = vrot.slane %v1053_v24, 4  ;;  %v1056_v34 = vrot.slane %v3453_v47, 5  ;;  %v3578_v2 = vld [vmem:[%s3245_s26 + $0x54] sm:$0xf]  ;;  %s2515_s26 = sshll.u32 %s3079_s22, 5 }
  0x4d   : > { %v661_v35 = vsel %vm3300_vm4, %v656_v26, %v660_v1  ;;  %v679_v42 = vor.u32 %v678_v27, %v674_v16  ;;  %v2414_v43 = vrot.slane %v3476_v0, 9  ;;  %v1060_v46 = vrot.slane %v3492_v25, 5  ;;  %s2185_s21 = sadd.s32 %s2537_s12, %s2515_s26 }
  0x4e   : > { %2716 = vmatmul.mubr.msk.bf16.gmra.mrb[4].mxu0 %vm712_vm5, %v3527_v10  ;;  %v3568_v48 = vcombine.low %v651_v9, %v661_v35  ;;  %v670_v47 = vrot.slane %v669_v30, 4  ;;  %v1057_v55 = vsel %vm3416_vm8, %v1055_v32, %v1056_v34  ;;  %v1063_v58 = vrot.slane %v3501_v29, 5  ;;  %v444_v34 = vld [vmem:[%s408_s8] sm:$0xf]  ;;  %s2516_s22 = sshll.u32 %s2185_s21, 6 }
  0x4f   : > { %v680_v57 = vrot.slane %v679_v42, 4  ;;  %v3573_v61 = vcombine.low %v1054_v31, %v1057_v55  ;;  %v1061_v63 = vsel %vm3416_vm8, %v2414_v43, %v1060_v46  ;;  %v1062_v1 = vrot.slane %v1060_v46, 4  ;;  %v445_v46 = vld [vmem:[%s408_s8 + $0x4] sm:$0xf]  ;;  %s3878_s15 = scalar_lea.hbm %s3947_s5, %s2516_s22 }
  0x50   : > { %2630 = vmatmul.mubr.msk.bf16.gmra.mrb[8].mxu1 %vm712_vm5, %v3535_v13  ;;  %v2415_v21 = vrot.slane %v3505_v17, 9  ;;  %v1067_v44 = vrot.slane %v3519_v62, 5  ;;  %v675_v29 = vsel %vm3300_vm4, %v670_v47, %v674_v16  ;;  %v1070_v15 = vrot.slane %v3531_v51, 5  ;;  %v446_v47 = vld [vmem:[%s408_s8 + $0x8] sm:$0x1]  ;;  %s2188_s8 = sshll.u32 %s3832_s14, 4  ;;  %s3880_s8 = int_to_ptr.vmem [resolvable:$true] %s2188_s8 }
  0x51   : > { %2633 = vmatprep.mubr.msk.bf16.mxu1 %vm712_vm5, %v3568_v48  ;;  %v685_v56 = vsel %vm3300_vm4, %v680_v57, %v684_v28  ;;  %2719 = vmatprep.mubr.msk.bf16.mxu0 %vm712_vm5, %v3573_v61  ;;  %v1064_v8 = vsel %vm3416_vm8, %v1062_v1, %v1063_v58  ;;  %v2453_v26 = vrot.slane %v3578_v2, 9  ;;  %v1515_v16 = vrot.slane %v3581_v6, 5  ;;  %v2433_v1 = vld [vmem:[%s3945_s3 + $0x6] sm:$0x3]  ;;  %s2997_s10 = scalar_lea.vmem %s3880_s8, 1024  ;;  %p3004_p12 = scmp.lt.s32.totalorder %s3880_s8, %s3002_s13 }
  0x52   : > { %v3606_v22 = vcombine.low %v1061_v63, %v1064_v8  ;;  %v1068_v24 = vsel %vm3416_vm8, %v2415_v21, %v1067_v44  ;;  %v1069_v9 = vrot.slane %v1067_v44, 4  ;;  %v1518_v27 = vrot.slane %v3588_v54, 5  ;;  %p2998_p9 = scmp.ne.s32.totalorder %s3880_s8, %s2997_s10  ;;  %p3005_p13 = scmp.lt.s32.totalorder %s3003_s30, %s2997_s10 }
  0x53   : > { %v3618_v28 = vcombine.low %v675_v29, %v685_v56  ;;  %v2392_v30 = vcombine.low %v3381_v38, %v3383_v39  ;;  %v1517_v32 = vrot.slane %v1515_v16, 4  ;;  %v461_v35 = vstv %s460_s27 }
  0x54   : > { %v1071_v51 = vsel %vm3416_vm8, %v1069_v9, %v1070_v15  ;;  %v1516_v42 = vsel %vm3416_vm8, %v2453_v26, %v1515_v16  ;;  %v3637_v55 = vmul.bf16 %v461_v35, %v444_v34  ;;  %v3641_v57 = vmul.bf16 %v461_v35, %v445_v46  ;;  %p2999_p10 = pnand %p2998_p9, %p3178_p3  ;;  %p3006_p0 = por %p3005_p13, %p3004_p12 }
  0x55   : > { %v3624_v31 = vcombine.low %v1068_v24, %v1071_v51  ;;  %v1519_v43 = vsel %vm3416_vm8, %v1517_v32, %v1518_v27  ;;  %v465_v63 = vmul.bf16 %v461_v35, %v446_v47  ;;  %v3649_v44 = vcombine.low %v3249_v11, %v3252_v12 }
  0x56   : > { %2720 = vmatmul.mubr.msk.bf16.gmra.mrb[8].mxu0 %vm712_vm5, %v3606_v22  ;;  %v3639_v58 = vcombine.low %v1516_v42, %v1519_v43  ;;  %v1771_v21 = vshrl.u32 %v3637_v55, 16  ;;  %v1774_v29 = vshll.u32 %v3637_v55, 16  ;;  %v1780_v56 = vshll.u32 %v3641_v57, 16  ;;  %p3000_p11 = pneg %p2999_p10 }
  0x57   : > { %2723 = vmatprep.mubr.msk.bf16.mxu0 %vm712_vm5, %v3624_v31  ;;  %v1784_v8 = vshrl.u32 %v3641_v57, 16  ;;  %v3656_v15 = vcombine.low %v3262_v18, %v3266_v20  ;;  %v1790_v9 = vshll.u32 %v465_v63, 16  ;;  %v2484_v26 = vrot.slane %v3637_v55, 9  ;;  %v2485_v18 = vld [vmem:[%s3945_s3 + $0x10] sm:$0x3] }
  0x58   : > { %2634 = vmatmul.mubr.msk.bf16.gmra.mrb[12].mxu1 %vm712_vm5, %v3618_v28  ;;  %v1773_v24 = vrot.slane %v1771_v21, 4  ;;  %v1249_v11 = vand.u32 %v2433_v1, %v3206_v3  ;;  %v1776_v12 = vrot.slane %v1774_v29, 5  ;;  %v1782_v16 = vrot.slane %v1780_v56, 5  ;;  %p3007_p1 = pnand %p3006_p0, %p3000_p11 }
  0x59   : > { %2639 = vmatprep.mubr.msk.bf16.mxu1 %vm712_vm5, %v2392_v30  ;;  %v1786_v27 = vrot.slane %v1784_v8, 4  ;;  %v1921_v51 = vrot.slane %v3641_v57, 5  ;;  %v1924_v30 = vrot.slane %v465_v63, 5  ;;  %v1792_v34 = vrot.slane %v1790_v9, 5 }
  0x5a   : > { %v1777_v20 = vor.u32 %v1776_v12, %v1773_v24  ;;  %v1935_v47 = vand.u32 %v2485_v18, %v3206_v3  ;;  %v3694_v3 = vcombine.low %v3339_v59, %v3358_v14  ;;  %v3714_v59 = vcombine.low %v3476_v0, %v3492_v25 }
  0x5b   : > { %v1787_v32 = vor.u32 %v1786_v27, %v1782_v16  ;;  %v3675_v35 = vsel %vm3416_vm8, %v2484_v26, %v1921_v51  ;;  %v1923_v42 = vrot.slane %v1921_v51, 4  ;;  %v2408_v14 = vrot.slane %v3381_v38, 9 }
  0x5c   : > { %v1778_v43 = vrot.slane %v1777_v20, 4  ;;  %v2399_v38 = vcombine.low %v3505_v17, %v3519_v62  ;;  %v2465_v0 = vcombine.low %v3637_v55, %v3641_v57  ;;  %v1365_v19 = vshrl.u32 %v3578_v2, 16 }
  0x5d   : > { %v1788_v46 = vrot.slane %v1787_v32, 4  ;;  %v3680_v63 = vsel %vm3416_vm8, %v1923_v42, %v1924_v30  ;;  %v1368_v25 = vshll.u32 %v3578_v2, 16  ;;  %v1374_v17 = vshll.u32 %v3581_v6, 16 }
  0x5e   : > { %2724 = vmatmul.mubr.msk.bf16.gmra.mrb[12].mxu0 %vm712_vm5, %v3639_v58  ;;  %v1783_v1 = vsel %vm3300_vm4, %v1778_v43, %v1782_v16  ;;  %v2486_v29 = vcombine.low %v3675_v35, %v3680_v63  ;;  %v1378_v62 = vshrl.u32 %v3581_v6, 16  ;;  %v1367_v55 = vrot.slane %v1365_v19, 4 }
  0x5f   : > { %2729 = vmatprep.mubr.msk.bf16.mxu0 %vm712_vm5, %v3656_v15  ;;  %v1793_v21 = vsel %vm3300_vm4, %v1788_v46, %v1792_v34  ;;  %v1370_v57 = vrot.slane %v1368_v25, 5 }
  0x60   : > { %2640 = vmatmul.mubr.msk.bf16.vlgmr.msra.gmra.mrb[0].mxu1 %vm712_vm5, %v3649_v44  ;;  %v3696_v56 = vcombine.low %v1783_v1, %v1793_v21  ;;  %v1380_v24 = vrot.slane %v1378_v62, 4 }
  0x61   : > { %2656 = vmatpush3.bf16.msra.mxu1 %v3316_v49  ;;  %2643 = vmatprep.mubr.msk.bf16.mxu1 %vm712_vm5, %v3656_v15  ;;  %v3684_v49 = vcombine.low %v3290_v36, %v3329_v53  ;;  %v1018_v36 = vrot.slane %v3383_v39, 5  ;;  %v3710_v53 = vcombine.low %v3409_v7, %v3438_v41  ;;  %v2434_v7 = vcombine.low %v3578_v2, %v3581_v6 }
  0x62   : > { %2673 = vmatprep.subr.bf16.mxu1 %v1249_v11  ;;  %v1384_v6 = vshll.u32 %v3588_v54, 16 }
  0x63   : > { %v1020_v8 = vrot.slane %v1018_v36, 4  ;;  %v1019_v39 = vsel %vm3416_vm8, %v2408_v14, %v1018_v36 }
  0x66   : > { %2730 = vmatmul.mubr.msk.bf16.vlgmr.msra.gmra.mrb[0].mxu0 %vm712_vm5, %v3684_v49 }
  0x67   : > { %2746 = vmatpush3.bf16.msra.mxu0 %v3342_v60  ;;  %2733 = vmatprep.mubr.msk.bf16.mxu0 %vm712_vm5, %v3694_v3  ;;  %v1021_v60 = vrot.slane %v3385_v40, 5 }
  0x68   : > { %2644 = vmatmul.mubr.msk.bf16.gmra.mrb[4].mxu1 %vm712_vm5, %v3684_v49  ;;  %2763 = vmatprep.subr.bf16.mxu0 %v1935_v47 }
  0x69   : > { %2647 = vmatprep.mubr.msk.bf16.mxu1 %vm712_vm5, %v3694_v3  ;;  %v1022_v40 = vsel %vm3416_vm8, %v1020_v8, %v1021_v60 }
  0x6a   : > { %v2417_v41 = vcombine.low %v1019_v39, %v1022_v40 }
  0x6e   : > { %2734 = vmatmul.mubr.msk.bf16.gmra.mrb[4].mxu0 %vm712_vm5, %v3710_v53 }
  0x6f   : > { %2737 = vmatprep.mubr.msk.bf16.mxu0 %vm712_vm5, %v3714_v59 }
  0x70   : > { %2648 = vmatmul.mubr.msk.bf16.gmra.mrb[8].mxu1 %vm712_vm5, %v3710_v53 }
  0x71   : > { %2651 = vmatprep.mubr.msk.bf16.mxu1 %vm712_vm5, %v3714_v59 }
  0x76   : > { %2738 = vmatmul.mubr.msk.bf16.gmra.mrb[8].mxu0 %vm712_vm5, %v2399_v38 }
  0x77   : > { %2741 = vmatprep.mubr.msk.bf16.mxu0 %vm712_vm5, %v2434_v7 }
  0x78   : > { %2652 = vmatmul.mubr.msk.bf16.gmra.mrb[12].mxu1 %vm712_vm5, %v2399_v38 }
  0x79   : > { %2657 = vmatprep.mubr.msk.bf16.mxu1 %vm712_vm5, %v2417_v41 }
  0x7e   : > { %2742 = vmatmul.mubr.msk.bf16.gmra.mrb[12].mxu0 %vm712_vm5, %v2465_v0 }
  0x7f   : > { %2747 = vmatprep.mubr.msk.bf16.mxu0 %vm712_vm5, %v3373_v23  ;;  %v1376_v23 = vrot.slane %v1374_v17, 5 }
  0x80   : > { %2658 = vmatmul.mubr.msk.bf16.vlgmr.msra.gmra.mrb[0].mxu1 %vm712_vm5, %v3464_v52  ;;  %v1371_v52 = vor.u32 %v1370_v57, %v1367_v55 }
  0x81   : > { %2674 = vmatpush3.bf16.msra.mxu1 %v1249_v11  ;;  %2661 = vmatprep.mubr.msk.bf16.mxu1 %vm712_vm5, %v3459_v50  ;;  %v1381_v2 = vor.u32 %v1380_v24, %v1376_v23  ;;  %v1386_v11 = vrot.slane %v1384_v6, 5 }
  0x82   : > { %2781 = vmatprep.subr.bf16.mxu1 %v3215_v5  ;;  %v1372_v9 = vrot.slane %v1371_v52, 4 }
  0x83   : > { %v1382_v26 = vrot.slane %v1381_v2, 4 }
  0x86   : > { %2748 = vmatmul.mubr.msk.bf16.vlgmr.msra.gmra.mrb[0].mxu0 %vm712_vm5, %v3404_v4  ;;  %v1377_v4 = vsel %vm3300_vm4, %v1372_v9, %v1376_v23 }
  0x87   : > { %2764 = vmatpush3.bf16.msra.mxu0 %v1935_v47  ;;  %2751 = vmatprep.mubr.msk.bf16.mxu0 %vm712_vm5, %v3448_v45  ;;  %v1387_v45 = vsel %vm3300_vm4, %v1382_v26, %v1386_v11 }
  0x88   : > { %2662 = vmatmul.mubr.msk.bf16.gmra.mrb[4].mxu1 %vm712_vm5, %v3512_v33  ;;  %v2444_v54 = vcombine.low %v1377_v4, %v1387_v45 }
  0x89   : > { %2665 = vmatprep.mubr.msk.bf16.mxu1 %vm712_vm5, %v3527_v10 }
  0x8e   : > { %2752 = vmatmul.mubr.msk.bf16.gmra.mrb[4].mxu0 %vm712_vm5, %v3535_v13 }
  0x8f   : > { %2755 = vmatprep.mubr.msk.bf16.mxu0 %vm712_vm5, %v3568_v48 }
  0x90   : > { %2666 = vmatmul.mubr.msk.bf16.gmra.mrb[8].mxu1 %vm712_vm5, %v3573_v61 }
  0x91   : > { %2669 = vmatprep.mubr.msk.bf16.mxu1 %vm712_vm5, %v3606_v22 }
  0x96   : > { %2756 = vmatmul.mubr.msk.bf16.gmra.mrb[8].mxu0 %vm712_vm5, %v3618_v28 }
  0x97   : > { %2759 = vmatprep.mubr.msk.bf16.mxu0 %vm712_vm5, %v2444_v54 }
  0x98   : > { %2670 = vmatmul.mubr.msk.bf16.gmra.mrb[12].mxu1 %vm712_vm5, %v3624_v31 }
  0x99   : > { %2675 = vmatprep.mubr.msk.bf16.mxu1 %vm712_vm5, %v3649_v44 }
  0x9e   : > { %2760 = vmatmul.mubr.msk.bf16.gmra.mrb[12].mxu0 %vm712_vm5, %v3696_v56 }
  0x9f   : > { %2765 = vmatprep.mubr.msk.bf16.mxu0 %vm712_vm5, %v3459_v50 }
  0xa0   : > { %2676 = vmatmul.mubr.msk.bf16.vlgmr.msra.gmra.mrb[0].mxu1 %vm712_vm5, %v3656_v15 }
  0xa1   : > { %2782 = vmatpush3.bf16.msra.mxu1 %v3215_v5  ;;  %2679 = vmatprep.mubr.msk.bf16.mxu1 %vm712_vm5, %v3684_v49 }
  0xa6   : > { %2766 = vmatmul.mubr.msk.bf16.vlgmr.msra.gmra.mrb[0].mxu0 %vm712_vm5, %v3512_v33 }
  0xa7   : > { %2769 = vmatprep.mubr.msk.bf16.mxu0 %vm712_vm5, %v3527_v10 }
  0xa8   : > { %2680 = vmatmul.mubr.msk.bf16.gmra.mrb[4].mxu1 %vm712_vm5, %v3694_v3 }
  0xa9   : > { %2683 = vmatprep.mubr.msk.bf16.mxu1 %vm712_vm5, %v3710_v53 }
  0xae   : > { %2770 = vmatmul.mubr.msk.bf16.gmra.mrb[4].mxu0 %vm712_vm5, %v3573_v61 }
  0xaf   : > { %2773 = vmatprep.mubr.msk.bf16.mxu0 %vm712_vm5, %v3606_v22 }
  0xb0   : > { %2684 = vmatmul.mubr.msk.bf16.gmra.mrb[8].mxu1 %vm712_vm5, %v3714_v59 }
  0xb1   : > { %2687 = vmatprep.mubr.msk.bf16.mxu1 %vm712_vm5, %v2399_v38 }
  0xb6   : > { %2774 = vmatmul.mubr.msk.bf16.gmra.mrb[8].mxu0 %vm712_vm5, %v3624_v31 }
  0xb7   : > { %2777 = vmatprep.mubr.msk.bf16.mxu0 %vm712_vm5, %v3639_v58 }
  0xb8   : > { %2688 = vmatmul.mubr.msk.bf16.gmra.mrb[12].mxu1 %vm712_vm5, %v2434_v7 }
  0xb9   : > { %2701 = vmatprep.mubr.msk.bf16.mxu1 %vm712_vm5, %v3535_v13  ;;  %v3824_v13 = vld [vmem:[%s3946_s4] ss:$0 sm:$0xff] }
  0xbe   : > { %2778 = vmatmul.mubr.msk.bf16.gmra.mrb[12].mxu0 %vm712_vm5, %v2486_v29 }
  0xc0   : > { %2702 = vmatmul.mubr.msk.bf16.vlgmr.msra.gmra.mrb[8].mxu1 %vm712_vm5, %v3568_v48 }
  0xc1   : > { %2705 = vmatprep.mubr.msk.bf16.mxu1 %vm712_vm5, %v3618_v28 }
  0xc8   : > { %2706 = vmatmul.mubr.msk.bf16.gmra.mrb[12].mxu1 %vm712_vm5, %v2444_v54 }
 0x173   : > { %v2677_v5 = vpop.f32.mrb[0].mxu1 }
 0x174   : > { %v1285_v37 = vpop.f32.mrb[1].mxu1 }
 0x175   : > { %v2678_v50 = vpop.f32.mrb[2].mxu1 }
 0x176   : > { %v1288_v33 = vpop.f32.mrb[3].mxu1 }
 0x179   : > { %v2767_v10 = vpop.f32.mrb[0].mxu0 }
 0x17a   : > { %v2783_v61 = vadd.f32 %v2767_v10, %v2677_v5  ;;  %v1971_v22 = vpop.f32.mrb[1].mxu0 }
 0x17b   : > { %v2681_v48 = vpop.f32.mrb[4].mxu1  ;;  %v2784_v31 = vadd.f32 %v1971_v22, %v1285_v37  ;;  %v2768_v58 = vpop.f32.mrb[2].mxu0 }
 0x17c   : > { %v1301_v44 = vpop.f32.mrb[5].mxu1  ;;  %v2059_v28 = vadd.f32 %v2783_v61, %v3824_v13  ;;  %v2785_v15 = vadd.f32 %v2768_v58, %v2678_v50  ;;  %v1974_v12 = vpop.f32.mrb[3].mxu0 }
 0x17d   : > { %v2682_v16 = vpop.f32.mrb[6].mxu1  ;;  %v2057_v27 = vadd.f32 %v2784_v31, %v3824_v13  ;;  %v2786_v51 = vadd.f32 %v1974_v12, %v1288_v33 }
 0x17e   : > { %v2075_v30 = vmax.f32 %v2059_v28, 0.0  ;;  %v1304_v18 = vpop.f32.mrb[7].mxu1  ;;  %v2060_v20 = vadd.f32 %v2785_v15, %v3824_v13 }
 0x17f   : > { %v2073_v32 = vmax.f32 %v2057_v27, 0.0  ;;  %v2058_v34 = vadd.f32 %v2786_v51, %v3824_v13 }
 0x180   : > { %v2523_v35 = vpack.c.bf16 %v2075_v30, %v2075_v30  ;;  %v2076_v42 = vmax.f32 %v2060_v20, 0.0 }
 0x181   : > { %v2521_v43 = vpack.c.bf16 %v2073_v32, %v2073_v32  ;;  %v2074_v46 = vmax.f32 %v2058_v34, 0.0  ;;  %v2771_v47 = vpop.f32.mrb[4].mxu0 }
 0x182   : > { %2156 = vst.msk [vmem:[%s3832_s14 + $0x8] sm:$0xf] %vm2153_vm9, %v2523_v35  ;;  %v2524_v63 = vpack.c.bf16 %v2076_v42, %v2076_v42  ;;  %v2787_v49 = vadd.f32 %v2771_v47, %v2681_v48  ;;  %v1987_v1 = vpop.f32.mrb[5].mxu0 }
 0x183   : > { %2154 = vst.msk [vmem:[%s3832_s14] sm:$0xf] %vm2153_vm9, %v2521_v43  ;;  %v2522_v21 = vpack.c.bf16 %v2074_v46, %v2074_v46  ;;  %v2788_v29 = vadd.f32 %v1987_v1, %v1301_v44  ;;  %v2772_v3 = vpop.f32.mrb[6].mxu0 }
 0x184   : > { %2157 = vst.msk [vmem:[%s3832_s14 + $0xc] sm:$0xf] %vm2153_vm9, %v2524_v63  ;;  %v2063_v56 = vadd.f32 %v2787_v49, %v3824_v13  ;;  %v2789_v36 = vadd.f32 %v2772_v3, %v2682_v16  ;;  %v1990_v53 = vpop.f32.mrb[7].mxu0 }
 0x185   : > { %2155 = vst.msk [vmem:[%s3832_s14 + $0x4] sm:$0xf] %vm2153_vm9, %v2522_v21  ;;  %v2061_v59 = vadd.f32 %v2788_v29, %v3824_v13  ;;  %v2790_v60 = vadd.f32 %v1990_v53, %v1304_v18 }
 0x186   : > { %v2079_v14 = vmax.f32 %v2063_v56, 0.0  ;;  %v2064_v8 = vadd.f32 %v2789_v36, %v3824_v13 }
 0x187   : > { %v2077_v39 = vmax.f32 %v2061_v59, 0.0  ;;  %v2062_v40 = vadd.f32 %v2790_v60, %v3824_v13 }
 0x188   : > { %v2527_v7 = vpack.c.bf16 %v2079_v14, %v2079_v14  ;;  %v2080_v38 = vmax.f32 %v2064_v8, 0.0 }
 0x189   : > { %v2525_v41 = vpack.c.bf16 %v2077_v39, %v2077_v39  ;;  %v2078_v0 = vmax.f32 %v2062_v40, 0.0  ;;  %v2775_v19 = vpop.f32.mrb[8].mxu0 }
 0x18a   : > { %2160 = vst.msk [vmem:[%s3832_s14 + $0x18] sm:$0xf] %vm2153_vm9, %v2527_v7  ;;  %v2528_v25 = vpack.c.bf16 %v2080_v38, %v2080_v38  ;;  %v2003_v17 = vpop.f32.mrb[9].mxu0 }
 0x18b   : > { %2158 = vst.msk [vmem:[%s3832_s14 + $0x10] sm:$0xf] %vm2153_vm9, %v2525_v41  ;;  %v2526_v62 = vpack.c.bf16 %v2078_v0, %v2078_v0  ;;  %v2776_v55 = vpop.f32.mrb[10].mxu0 }
 0x18c   : > { %2161 = vst.msk [vmem:[%s3832_s14 + $0x1c] sm:$0xf] %vm2153_vm9, %v2528_v25  ;;  %v2006_v57 = vpop.f32.mrb[11].mxu0 }
 0x18d   : > { %2159 = vst.msk [vmem:[%s3832_s14 + $0x14] sm:$0xf] %vm2153_vm9, %v2526_v62 }
 0x191   : > { %v2779_v23 = vpop.f32.mrb[12].mxu0 }
 0x192   : > { %v2019_v24 = vpop.f32.mrb[13].mxu0 }
 0x193   : > { %v2703_v52 = vpop.f32.mrb[8].mxu1  ;;  %v2780_v2 = vpop.f32.mrb[14].mxu0 }
 0x194   : > { %v2791_v6 = vadd.f32 %v2775_v19, %v2703_v52  ;;  %v1465_v9 = vpop.f32.mrb[9].mxu1  ;;  %v2022_v26 = vpop.f32.mrb[15].mxu0 }
 0x195   : > { %v2792_v11 = vadd.f32 %v2003_v17, %v1465_v9  ;;  %v2704_v4 = vpop.f32.mrb[10].mxu1 }
 0x196   : > { %v2067_v45 = vadd.f32 %v2791_v6, %v3824_v13  ;;  %v2793_v54 = vadd.f32 %v2776_v55, %v2704_v4  ;;  %v1468_v5 = vpop.f32.mrb[11].mxu1 }
 0x197   : > { %v2065_v37 = vadd.f32 %v2792_v11, %v3824_v13  ;;  %v2794_v50 = vadd.f32 %v2006_v57, %v1468_v5 }
 0x198   : > { %v2083_v33 = vmax.f32 %v2067_v45, 0.0  ;;  %v2068_v10 = vadd.f32 %v2793_v54, %v3824_v13 }
 0x199   : > { %v2081_v61 = vmax.f32 %v2065_v37, 0.0  ;;  %v2066_v22 = vadd.f32 %v2794_v50, %v3824_v13 }
 0x19a   : > { %v2531_v48 = vpack.c.bf16 %v2083_v33, %v2083_v33  ;;  %v2084_v31 = vmax.f32 %v2068_v10, 0.0 }
 0x19b   : > { %v2529_v58 = vpack.c.bf16 %v2081_v61, %v2081_v61  ;;  %v2082_v44 = vmax.f32 %v2066_v22, 0.0  ;;  %v2707_v28 = vpop.f32.mrb[12].mxu1 }
 0x19c   : > { %2164 = vst.msk [vmem:[%s3832_s14 + $0x28] sm:$0xf] %vm2153_vm9, %v2531_v48  ;;  %v2532_v15 = vpack.c.bf16 %v2084_v31, %v2084_v31  ;;  %v2795_v12 = vadd.f32 %v2779_v23, %v2707_v28  ;;  %v1481_v16 = vpop.f32.mrb[13].mxu1 }
 0x19d   : > { %2162 = vst.msk [vmem:[%s3832_s14 + $0x20] sm:$0xf] %vm2153_vm9, %v2529_v58  ;;  %v2530_v27 = vpack.c.bf16 %v2082_v44, %v2082_v44  ;;  %v2796_v51 = vadd.f32 %v2019_v24, %v1481_v16  ;;  %v2708_v30 = vpop.f32.mrb[14].mxu1 }
 0x19e   : > { %2165 = vst.msk [vmem:[%s3832_s14 + $0x2c] sm:$0xf] %vm2153_vm9, %v2532_v15  ;;  %v2071_v18 = vadd.f32 %v2795_v12, %v3824_v13  ;;  %v2797_v20 = vadd.f32 %v2780_v2, %v2708_v30  ;;  %v1484_v32 = vpop.f32.mrb[15].mxu1 }
 0x19f   : > { %2163 = vst.msk [vmem:[%s3832_s14 + $0x24] sm:$0xf] %vm2153_vm9, %v2530_v27  ;;  %v2069_v34 = vadd.f32 %v2796_v51, %v3824_v13  ;;  %v2798_v35 = vadd.f32 %v2022_v26, %v1484_v32 }
 0x1a0   : > { %v2087_v42 = vmax.f32 %v2071_v18, 0.0  ;;  %v2072_v43 = vadd.f32 %v2797_v20, %v3824_v13 }
 0x1a1   : > { %v2085_v46 = vmax.f32 %v2069_v34, 0.0  ;;  %v2070_v47 = vadd.f32 %v2798_v35, %v3824_v13 }
 0x1a2   : > { %v2535_v63 = vpack.c.bf16 %v2087_v42, %v2087_v42  ;;  %v2088_v49 = vmax.f32 %v2072_v43, 0.0 }
 0x1a3   : > { %v2533_v1 = vpack.c.bf16 %v2085_v46, %v2085_v46  ;;  %v2086_v21 = vmax.f32 %v2070_v47, 0.0 }
 0x1a4   : > { %2168 = vst.msk [vmem:[%s3832_s14 + $0x38] sm:$0xf] %vm2153_vm9, %v2535_v63  ;;  %v2536_v29 = vpack.c.bf16 %v2088_v49, %v2088_v49 }
 0x1a5   : > { %2166 = vst.msk [vmem:[%s3832_s14 + $0x30] sm:$0xf] %vm2153_vm9, %v2533_v1  ;;  %v2534_v13 = vpack.c.bf16 %v2086_v21, %v2086_v21 }
 0x1a6   : > { %2169 = vst.msk [vmem:[%s3832_s14 + $0x3c] sm:$0xf] %vm2153_vm9, %v2536_v29 }
 0x1a7   : > { %2167 = vst.msk [vmem:[%s3832_s14 + $0x34] sm:$0xf] %vm2153_vm9, %v2534_v13 }
 0x1a8   : > { %3010 = shalt.err (!%p3007_p1)
}
 0x1a9   : > { %s3011_s16 = scalar_lea.hbm %s3878_s15, 1024  ;;  %s3015_s26 = scalar_lea.hbm %s3947_s5, 4096 }
 0x1aa   : > { %p3012_p2 = scmp.ne.s32.totalorder %s3878_s15, %s3011_s16  ;;  %p3016_p6 = scmp.lt.u32.totalorder %s3878_s15, %s3947_s5 }
 0x1ab   : > { %p3017_p7 = scmp.lt.u32.totalorder %s3015_s26, %s3011_s16  ;;  %p3019_p10 = scmp.lt.u32.totalorder %s3011_s16, %s3878_s15 }
 0x1ac   : > { %p3013_p4 = pnand %p3012_p2, %p3178_p3 }
 0x1ad   : > { %p3018_p9 = por %p3017_p7, %p3016_p6 }
 0x1ae   : > { %p3014_p5 = pneg %p3013_p4 }
 0x1af   : > { %p3020_p11 = por %p3019_p10, %p3018_p9 }
 0x1b1   : > { %p3021_p12 = pnand %p3020_p11, %p3014_p5 }
 0x1b3   : > { %3024 = shalt.err (!%p3021_p12)
}
 0x1b4   : > { %s3095_s27 = smov 64   ;;  %s3096_s17 = smov 4  }
 0x1b5   : > { %2915 = dma.vmem_to_hbm [thread:$0]  (%p3178_p3), %s3880_s8, 1024, %s3878_s15, %s3890_s9, %s3095_s27, %s3095_s27, %s3096_s17  }
 0x1b6 PF: > { %p2921_p13 = scmp.ge.s32.totalorder %s3091_s25, 2  ;;  %s2203_s10 = sand.u32 1, %s3063_s18  }
 0x1b7   : > { %s2204_s0 = scalar_lea.sflag [#allocation3], %s2203_s10 }
 0x1b8   : > { %p2918_p0 = pnand %p2921_p13, %p3187_p8 }
 0x1ba   : > { %3058 = dma.done.wait (!%p2918_p0), %s2204_s0, 1024  }
 0x1bb   : > { %3060 = vsyncadd (!%p2918_p0), %s2204_s0, 4294966272  ;;  %s18_s25 = sadd.s32 1, %s3091_s25   ;;  %s3959_s18 = smov %s3067_s19 }
 0x1bc   : > { %p15_p1 = scmp.ge.s32.totalorder %s18_s25, 6   ;;  %s3960_s19 = smov %s3071_s20 }
 0x1bd   : > { %s3961_s20 = smov %s3196_s11  ;;  %s3962_s21 = smov %s3083_s23 }
 0x1be   : > { %s3963_s22 = smov %s3087_s24  ;;  %s3964_s23 = smov %s3967_s28 }
 0x1bf   : > { %s3965_s24 = smov %s3971_s29  ;;  %17 = sbr.rel (!%p15_p1) target bundleno = 7 (0x7), region = 95 }
 0x1c6   :  { %2209 = vsyncpa [#allocation3], 1 }
 0x1c7   :  { %2211 = vsyncpa [#allocation3 + $0x1], 1 }

</bundles_post_ra>
